<compile_context>
chip_gen: v7x
topology: tpu7x:2x2x1
jax: 0.10.0
libtpu: 0.0.40
codegen_flags: <defaults>
</compile_context>

<pallas_src>
import math
import functools

import jax
import jax.numpy as jnp
from jax.experimental import pallas as pl
from jax.experimental.pallas import tpu as pltpu

EPS = 1e-6


def _layer_norm(x, a, b, eps=EPS, use_eup_recip=False):
    """Matches the module's LayerNorm: a*(x-mean)/(std+eps)+b, unbiased std."""
    d = x.shape[-1]
    mean = jnp.mean(x, axis=-1, keepdims=True)
    var = jnp.sum((x - mean) ** 2, axis=-1, keepdims=True) * (1.0 / (d - 1))
    std = jnp.sqrt(var)
    if use_eup_recip:
        inv = pl.reciprocal(std + eps, approx=True)     # EUP slot, ~free
    else:
        inv = 1.0 / (std + eps)
    return a * (x - mean) * inv + b


# ----------------------------------------------------------------------------
# Pallas kernel: whole encoder stack, one (batch, layer) grid
# ----------------------------------------------------------------------------
def _encoder_stack_kernel(n_heads,
                          x_ref, m_ref,
                          ln1a_ref, ln1b_ref, wqkv_ref, bqkv_ref, wo_ref, bo_ref,
                          ln2a_ref, ln2b_ref, w1_ref, b1_ref, w2_ref, b2_ref,
                          norm_a_ref, norm_b_ref,
                          o_ref, x_sc):
    layer = pl.program_id(1)
    n_layers = pl.num_programs(1)

    # Load the input activation into the layer-resident VMEM scratch once.
    @pl.when(layer == 0)
    def _():
        x_sc[...] = x_ref[0]

    x = x_sc[...]                        # (S, D) float32
    m = m_ref[0]                         # (1, S)  1.0 = valid key, 0.0 = pad
    S, D = x.shape
    dk = D // n_heads
    scale = 1.0 / math.sqrt(dk)

    # Additive mask bias, computed once (not per head).
    bias = jnp.where(m == 0.0, jnp.float32(-1e9), jnp.float32(0.0))   # (1, S)

    # ---- self-attention sublayer: x + attn(norm(x)) -------------------------
    xn = _layer_norm(x, ln1a_ref[0], ln1b_ref[0], use_eup_recip=True)
    qkv = jnp.dot(xn.astype(jnp.bfloat16), wqkv_ref[0],
                  preferred_element_type=jnp.float32) + bqkv_ref[0]    # (S, 3D)

    # Batch heads: (H, S, dk) operands -> one score einsum + one ctx einsum.
    q_heads, k_heads, v_heads = [], [], []
    for h in range(n_heads):
        lo, hi = h * dk, (h + 1) * dk
        q_heads.append(qkv[:, lo:hi] * scale)
        k_heads.append(qkv[:, D + lo:D + hi])
        v_heads.append(qkv[:, 2 * D + lo:2 * D + hi])
    qh = jnp.stack(q_heads).astype(jnp.bfloat16)       # (H, S, dk)
    kh = jnp.stack(k_heads).astype(jnp.bfloat16)
    vh = jnp.stack(v_heads).astype(jnp.bfloat16)

    scores = jnp.einsum("hqd,hkd->hqk", qh, kh,
                        preferred_element_type=jnp.float32) + bias     # (H, S, S)
    smax = jnp.max(scores, axis=-1, keepdims=True)
    p = jnp.exp(scores - smax)
    p = p * pl.reciprocal(jnp.sum(p, axis=-1, keepdims=True), approx=True)
    ctx = jnp.einsum("hqk,hkd->hqd", p.astype(jnp.bfloat16), vh,
                     preferred_element_type=jnp.float32)               # (H, S, dk)

    # Merge heads along lanes; ONE full-width output projection matmul.
    ctx_cat = jnp.concatenate([ctx[h] for h in range(n_heads)], axis=-1)  # (S, D)
    attn = jnp.dot(ctx_cat.astype(jnp.bfloat16), wo_ref[0],
                   preferred_element_type=jnp.float32) + bo_ref[0]
    x = x + attn

    # ---- feed-forward sublayer: x + ffn(norm(x)) ----------------------------
    xn2 = _layer_norm(x, ln2a_ref[0], ln2b_ref[0], use_eup_recip=True)
    hidden = jnp.dot(xn2.astype(jnp.bfloat16), w1_ref[0],
                     preferred_element_type=jnp.float32) + b1_ref[0]
    hidden = jnp.maximum(hidden, 0.0)
    ff = jnp.dot(hidden.astype(jnp.bfloat16), w2_ref[0],
                 preferred_element_type=jnp.float32) + b2_ref[0]
    x = x + ff

    x_sc[...] = x

    # Fused final LayerNorm + output store on the last layer iteration.
    @pl.when(layer == n_layers - 1)
    def _():
        o_ref[...] = _layer_norm(x, norm_a_ref[...], norm_b_ref[...],
                                 use_eup_recip=True)[None]


# ----------------------------------------------------------------------------
# Wrapper
# ----------------------------------------------------------------------------
def encoder_forward_pallas(x, mask2, layer_params, norm_a, norm_b, n_heads):
    B, S, D = x.shape
    L = len(layer_params)
    assert D % n_heads == 0
    mask3 = mask2.reshape(B, 1, S).astype(jnp.float32)

    def stack(name):
        return jnp.stack([p[name] for p in layer_params])

    # Fused QKV weight/bias; weights in bf16 (MXU-native, half the DMA bytes).
    wqkv = jnp.stack([jnp.concatenate([p["wq"], p["wk"], p["wv"]], axis=1)
                      for p in layer_params]).astype(jnp.bfloat16)       # (L, D, 3D)
    bqkv = jnp.stack([jnp.concatenate([p["bq"], p["bk"], p["bv"]], axis=1)
                      for p in layer_params])                             # (L, 1, 3D)
    wo = stack("wo").astype(jnp.bfloat16)
    w1 = stack("w1").astype(jnp.bfloat16)
    w2 = stack("w2").astype(jnp.bfloat16)
    bo, b1, b2 = stack("bo"), stack("b1"), stack("b2")
    ln1a, ln1b = stack("ln1a"), stack("ln1b")
    ln2a, ln2b = stack("ln2a"), stack("ln2b")

    def batch_spec(arr):          # indexed by batch, constant over layers
        nd = arr.ndim
        return pl.BlockSpec((1,) + arr.shape[1:],
                            lambda b, l, _nd=nd: (b,) + (0,) * (_nd - 1))

    def layer_spec(arr):          # indexed by layer, constant over batch
        nd = arr.ndim
        return pl.BlockSpec((1,) + arr.shape[1:],
                            lambda b, l, _nd=nd: (l,) + (0,) * (_nd - 1))

    def const_spec(arr):          # whole array, every grid step
        nd = arr.ndim
        return pl.BlockSpec(arr.shape, lambda b, l, _nd=nd: (0,) * _nd)

    kernel = functools.partial(_encoder_stack_kernel, n_heads)
    return pl.pallas_call(
        kernel,
        out_shape=jax.ShapeDtypeStruct((B, S, D), jnp.float32),
        grid=(B, L),
        in_specs=[
            batch_spec(x), batch_spec(mask3),
            layer_spec(ln1a), layer_spec(ln1b),
            layer_spec(wqkv), layer_spec(bqkv),
            layer_spec(wo), layer_spec(bo),
            layer_spec(ln2a), layer_spec(ln2b),
            layer_spec(w1), layer_spec(b1),
            layer_spec(w2), layer_spec(b2),
            const_spec(norm_a), const_spec(norm_b),
        ],
        out_specs=pl.BlockSpec((1, S, D), lambda b, l: (b, 0, 0)),
        scratch_shapes=[pltpu.VMEM((S, D), jnp.float32)],
        compiler_params=pltpu.CompilerParams(
            dimension_semantics=("parallel", "arbitrary")),
    )(x, mask3, ln1a, ln1b, wqkv, bqkv, wo, bo, ln2a, ln2b,
      w1, b1, w2, b2, norm_a, norm_b)


# ----------------------------------------------------------------------------
# Pure-JAX f32 reference (same math as the PyTorch module) for sanity checking
# ----------------------------------------------------------------------------
def encoder_forward_ref(x, mask2, layer_params, norm_a, norm_b, n_heads):
    B, S, D = x.shape
    dk = D // n_heads
    for p in layer_params:
        xn = _layer_norm(x, p["ln1a"], p["ln1b"])
        q = xn @ p["wq"] + p["bq"]
        k = xn @ p["wk"] + p["bk"]
        v = xn @ p["wv"] + p["bv"]
        qh = q.reshape(B, S, n_heads, dk).transpose(0, 2, 1, 3)
        kh = k.reshape(B, S, n_heads, dk).transpose(0, 2, 1, 3)
        vh = v.reshape(B, S, n_heads, dk).transpose(0, 2, 1, 3)
        scores = qh @ kh.transpose(0, 1, 3, 2) / math.sqrt(dk)
        scores = jnp.where(mask2[:, None, None, :] == 0.0, -1e9, scores)
        attn = jax.nn.softmax(scores, axis=-1)
        ctx = (attn @ vh).transpose(0, 2, 1, 3).reshape(B, S, D)
        x = x + ctx @ p["wo"] + p["bo"]
        xn2 = _layer_norm(x, p["ln2a"], p["ln2b"])
        x = x + jnp.maximum(xn2 @ p["w1"] + p["b1"], 0.0) @ p["w2"] + p["b2"]
    return _layer_norm(x, norm_a, norm_b)


# ----------------------------------------------------------------------------
# Deterministic parameter / input construction
# ----------------------------------------------------------------------------
def init_params(key, n_layers, d_model, d_ff):
    def w(k, fan_in, fan_out):
        return jax.random.normal(k, (fan_in, fan_out), jnp.float32) / math.sqrt(fan_in)

    layers = []
    for _ in range(n_layers):
        key, *ks = jax.random.split(key, 7)
        layers.append(dict(
            ln1a=jnp.ones((1, d_model), jnp.float32),
            ln1b=jnp.zeros((1, d_model), jnp.float32),
            wq=w(ks[0], d_model, d_model), bq=jnp.zeros((1, d_model), jnp.float32),
            wk=w(ks[1], d_model, d_model), bk=jnp.zeros((1, d_model), jnp.float32),
            wv=w(ks[2], d_model, d_model), bv=jnp.zeros((1, d_model), jnp.float32),
            wo=w(ks[3], d_model, d_model), bo=jnp.zeros((1, d_model), jnp.float32),
            ln2a=jnp.ones((1, d_model), jnp.float32),
            ln2b=jnp.zeros((1, d_model), jnp.float32),
            w1=w(ks[4], d_model, d_ff), b1=jnp.zeros((1, d_ff), jnp.float32),
            w2=w(ks[5], d_ff, d_model), b2=jnp.zeros((1, d_model), jnp.float32),
        ))
    norm_a = jnp.ones((1, d_model), jnp.float32)
    norm_b = jnp.zeros((1, d_model), jnp.float32)
    return layers, norm_a, norm_b, key


def make_mask(s_len, seq):
    # Equivalent of the module-level `mask(src, s_len)`: 1 for valid positions.
    pos = jnp.arange(seq)[None, :]
    return (pos < jnp.asarray(s_len)[:, None]).astype(jnp.float32)


if __name__ == "__main__":
    B, S, D, H, DFF, N_LAYERS = 2, 8, 32, 4, 64, 2

    key = jax.random.PRNGKey(0)
    key, kx = jax.random.split(key)
    x = jax.random.normal(kx, (B, S, D), jnp.float32)
    s_len = [8, 5]
    mask2 = make_mask(s_len, S)                       # (B, S)

    layer_params, norm_a, norm_b, _ = init_params(key, N_LAYERS, D, DFF)

    out = encoder_forward_pallas(x, mask2, layer_params, norm_a, norm_b, H)
    out = jax.block_until_ready(out)

    ref = encoder_forward_ref(x, mask2, layer_params, norm_a, norm_b, H)
    ref = jax.block_until_ready(ref)

    max_err = float(jnp.max(jnp.abs(out - ref)))
    assert out.shape == (B, S, D)
    # bf16 MXU operands + EUP approx reciprocals vs an f32 reference: typical
    # max deviation at these shapes is ~1e-2 to 3e-2.
    assert max_err < 1e-1, f"mismatch vs reference: {max_err}"

    print("KERNEL_OK")
</pallas_src>

<mosaic_0001>
module attributes {stable_mosaic.version = 11 : i64} {
  func.func @_encoder_stack_kernel(%arg0: i32, %arg1: i32, %arg2: memref<1x8x32xf32, #tpu.memory_space<vmem>>, %arg3: memref<1x1x8xf32, #tpu.memory_space<vmem>>, %arg4: memref<1x1x32xf32, #tpu.memory_space<vmem>>, %arg5: memref<1x1x32xf32, #tpu.memory_space<vmem>>, %arg6: memref<1x32x96xbf16, #tpu.memory_space<vmem>>, %arg7: memref<1x1x96xf32, #tpu.memory_space<vmem>>, %arg8: memref<1x32x32xbf16, #tpu.memory_space<vmem>>, %arg9: memref<1x1x32xf32, #tpu.memory_space<vmem>>, %arg10: memref<1x1x32xf32, #tpu.memory_space<vmem>>, %arg11: memref<1x1x32xf32, #tpu.memory_space<vmem>>, %arg12: memref<1x32x64xbf16, #tpu.memory_space<vmem>>, %arg13: memref<1x1x64xf32, #tpu.memory_space<vmem>>, %arg14: memref<1x64x32xbf16, #tpu.memory_space<vmem>>, %arg15: memref<1x1x32xf32, #tpu.memory_space<vmem>>, %arg16: memref<1x32xf32, #tpu.memory_space<vmem>>, %arg17: memref<1x32xf32, #tpu.memory_space<vmem>>, %arg18: memref<1x8x32xf32, #tpu.memory_space<vmem>>, %arg19: memref<8x32xf32, #tpu.memory_space<vmem>>) attributes {dimension_semantics = [#tpu.dimension_semantics<parallel>, #tpu.dimension_semantics<arbitrary>], iteration_bounds = array<i64: 2, 2>, scalar_prefetch = 0 : i64, scratch_operands = 1 : i64, tpu.core_type = #tpu.core_type<tc>, window_params = [{transform_indices = @transform_0, window_bounds = array<i64: 1, 8, 32>}, {transform_indices = @transform_1, window_bounds = array<i64: 1, 1, 8>}, {transform_indices = @transform_2, window_bounds = array<i64: 1, 1, 32>}, {transform_indices = @transform_3, window_bounds = array<i64: 1, 1, 32>}, {transform_indices = @transform_4, window_bounds = array<i64: 1, 32, 96>}, {transform_indices = @transform_5, window_bounds = array<i64: 1, 1, 96>}, {transform_indices = @transform_6, window_bounds = array<i64: 1, 32, 32>}, {transform_indices = @transform_7, window_bounds = array<i64: 1, 1, 32>}, {transform_indices = @transform_8, window_bounds = array<i64: 1, 1, 32>}, {transform_indices = @transform_9, window_bounds = array<i64: 1, 1, 32>}, {transform_indices = @transform_10, window_bounds = array<i64: 1, 32, 64>}, {transform_indices = @transform_11, window_bounds = array<i64: 1, 1, 64>}, {transform_indices = @transform_12, window_bounds = array<i64: 1, 64, 32>}, {transform_indices = @transform_13, window_bounds = array<i64: 1, 1, 32>}, {pipeline_mode = #tpu.pipeline_mode<synchronous>, transform_indices = @transform_14, window_bounds = array<i64: 1, 32>}, {pipeline_mode = #tpu.pipeline_mode<synchronous>, transform_indices = @transform_15, window_bounds = array<i64: 1, 32>}, {transform_indices = @transform_16, window_bounds = array<i64: 1, 8, 32>}]} {
    %c0_i32 = arith.constant 0 : i32
    %0 = arith.cmpi eq, %arg1, %c0_i32 : i32
    %1 = arith.extui %0 : i1 to i32
    %c0_i32_0 = arith.constant 0 : i32
    %2 = arith.cmpi ne, %1, %c0_i32_0 : i32
    scf.if %2 {
      %c0_69 = arith.constant 0 : index
      %c0_70 = arith.constant 0 : index
      %c0_71 = arith.constant 0 : index
      %168 = vector.load %arg2[%c0_69, %c0_70, %c0_71] : memref<1x8x32xf32, #tpu.memory_space<vmem>>, vector<1x8x32xf32>
      %169 = vector.shape_cast %168 : vector<1x8x32xf32> to vector<8x32xf32>
      %c0_72 = arith.constant 0 : index
      %c0_73 = arith.constant 0 : index
      %170 = vector.load %arg19[%c0_72, %c0_73] : memref<8x32xf32, #tpu.memory_space<vmem>>, vector<8x32xf32>
      tpu.vector_store %arg19[%c0_72, %c0_73], %169 {strides = array<i32>} : memref<8x32xf32, #tpu.memory_space<vmem>>, vector<8x32xf32>,
    } else {
    }
    %c0 = arith.constant 0 : index
    %c0_1 = arith.constant 0 : index
    %3 = vector.load %arg19[%c0, %c0_1] : memref<8x32xf32, #tpu.memory_space<vmem>>, vector<8x32xf32>
    %c0_2 = arith.constant 0 : index
    %c0_3 = arith.constant 0 : index
    %c0_4 = arith.constant 0 : index
    %4 = vector.load %arg3[%c0_2, %c0_3, %c0_4] : memref<1x1x8xf32, #tpu.memory_space<vmem>>, vector<1x1x8xf32>
    %5 = vector.shape_cast %4 : vector<1x1x8xf32> to vector<1x8xf32>
    %cst = arith.constant 0.000000e+00 : f32
    %6 = vector.broadcast %cst : f32 to vector<1x8xf32>
    %7 = arith.cmpf oeq, %5, %6 : vector<1x8xf32>
    %cst_5 = arith.constant -1.000000e+09 : f32
    %cst_6 = arith.constant 0.000000e+00 : f32
    %8 = vector.broadcast %cst_5 : f32 to vector<1x8xf32>
    %9 = vector.broadcast %cst_6 : f32 to vector<1x8xf32>
    %10 = arith.select %7, %8, %9 : vector<1x8xi1>, vector<1x8xf32>
    %c0_7 = arith.constant 0 : index
    %c0_8 = arith.constant 0 : index
    %c0_9 = arith.constant 0 : index
    %11 = vector.load %arg4[%c0_7, %c0_8, %c0_9] : memref<1x1x32xf32, #tpu.memory_space<vmem>>, vector<1x1x32xf32>
    %12 = vector.shape_cast %11 : vector<1x1x32xf32> to vector<1x32xf32>
    %c0_10 = arith.constant 0 : index
    %c0_11 = arith.constant 0 : index
    %c0_12 = arith.constant 0 : index
    %13 = vector.load %arg5[%c0_10, %c0_11, %c0_12] : memref<1x1x32xf32, #tpu.memory_space<vmem>>, vector<1x1x32xf32>
    %14 = vector.shape_cast %13 : vector<1x1x32xf32> to vector<1x32xf32>
    %cst_13 = arith.constant dense<0.000000e+00> : vector<8xf32>
    %15 = vector.multi_reduction <add>, %3, %cst_13 [1] : vector<8x32xf32> to vector<8xf32>
    %16 = vector.shape_cast %15 : vector<8xf32> to vector<8x1xf32>
    %cst_14 = arith.constant 3.200000e+01 : f32
    %17 = vector.broadcast %cst_14 : f32 to vector<8x1xf32>
    %18 = arith.divf %16, %17 : vector<8x1xf32>
    %19 = vector.broadcast %18 : vector<8x1xf32> to vector<8x32xf32>
    %20 = arith.subf %3, %19 : vector<8x32xf32>
    %21 = arith.mulf %20, %20 : vector<8x32xf32>
    %cst_15 = arith.constant dense<0.000000e+00> : vector<8xf32>
    %22 = vector.multi_reduction <add>, %21, %cst_15 [1] : vector<8x32xf32> to vector<8xf32>
    %23 = vector.shape_cast %22 : vector<8xf32> to vector<8x1xf32>
    %cst_16 = arith.constant 0.0322580636 : f32
    %24 = vector.broadcast %cst_16 : f32 to vector<8x1xf32>
    %25 = arith.mulf %23, %24 : vector<8x1xf32>
    %26 = math.sqrt %25 : vector<8x1xf32>
    %cst_17 = arith.constant 9.99999997E-7 : f32
    %27 = vector.broadcast %cst_17 : f32 to vector<8x1xf32>
    %28 = arith.addf %26, %27 : vector<8x1xf32>
    %29 = tpu.reciprocal %28 {approx = true} : vector<8x1xf32> -> vector<8x1xf32>
    %30 = vector.broadcast %18 : vector<8x1xf32> to vector<8x32xf32>
    %31 = arith.subf %3, %30 : vector<8x32xf32>
    %32 = vector.broadcast %12 : vector<1x32xf32> to vector<8x32xf32>
    %33 = arith.mulf %32, %31 : vector<8x32xf32>
    %34 = vector.broadcast %29 : vector<8x1xf32> to vector<8x32xf32>
    %35 = arith.mulf %33, %34 : vector<8x32xf32>
    %36 = vector.broadcast %14 : vector<1x32xf32> to vector<8x32xf32>
    %37 = arith.addf %35, %36 : vector<8x32xf32>
    %38 = arith.truncf %37 : vector<8x32xf32> to vector<8x32xbf16>
    %c0_18 = arith.constant 0 : index
    %c0_19 = arith.constant 0 : index
    %c0_20 = arith.constant 0 : index
    %39 = vector.load %arg6[%c0_18, %c0_19, %c0_20] : memref<1x32x96xbf16, #tpu.memory_space<vmem>>, vector<1x32x96xbf16>
    %40 = vector.shape_cast %39 : vector<1x32x96xbf16> to vector<32x96xbf16>
    %cst_21 = arith.constant dense<0.000000e+00> : vector<8x96xf32>
    %41 = tpu.matmul %38, %40, %cst_21 {dimension_numbers = #tpu.dot_dimension_numbers<[1], [0], [0], [1], [0, 0, 1, 1], [], []>} : vector<8x32xbf16>, vector<32x96xbf16>, vector<8x96xf32> -> vector<8x96xf32>
    %c0_22 = arith.constant 0 : index
    %c0_23 = arith.constant 0 : index
    %c0_24 = arith.constant 0 : index
    %42 = vector.load %arg7[%c0_22, %c0_23, %c0_24] : memref<1x1x96xf32, #tpu.memory_space<vmem>>, vector<1x1x96xf32>
    %43 = vector.shape_cast %42 : vector<1x1x96xf32> to vector<1x96xf32>
    %44 = vector.broadcast %43 : vector<1x96xf32> to vector<8x96xf32>
    %45 = arith.addf %41, %44 : vector<8x96xf32>
    %46 = vector.extract_strided_slice %45 {offsets = [0, 0], sizes = [8, 8], strides = [1, 1]} : vector<8x96xf32> to vector<8x8xf32>
    %cst_25 = arith.constant 0.353553385 : f32
    %47 = vector.broadcast %cst_25 : f32 to vector<8x8xf32>
    %48 = arith.mulf %46, %47 : vector<8x8xf32>
    %49 = vector.extract_strided_slice %45 {offsets = [0, 32], sizes = [8, 8], strides = [1, 1]} : vector<8x96xf32> to vector<8x8xf32>
    %50 = vector.extract_strided_slice %45 {offsets = [0, 64], sizes = [8, 8], strides = [1, 1]} : vector<8x96xf32> to vector<8x8xf32>
    %51 = vector.extract_strided_slice %45 {offsets = [0, 8], sizes = [8, 8], strides = [1, 1]} : vector<8x96xf32> to vector<8x8xf32>
    %cst_26 = arith.constant 0.353553385 : f32
    %52 = vector.broadcast %cst_26 : f32 to vector<8x8xf32>
    %53 = arith.mulf %51, %52 : vector<8x8xf32>
    %54 = vector.extract_strided_slice %45 {offsets = [0, 40], sizes = [8, 8], strides = [1, 1]} : vector<8x96xf32> to vector<8x8xf32>
    %55 = vector.extract_strided_slice %45 {offsets = [0, 72], sizes = [8, 8], strides = [1, 1]} : vector<8x96xf32> to vector<8x8xf32>
    %56 = vector.extract_strided_slice %45 {offsets = [0, 16], sizes = [8, 8], strides = [1, 1]} : vector<8x96xf32> to vector<8x8xf32>
    %cst_27 = arith.constant 0.353553385 : f32
    %57 = vector.broadcast %cst_27 : f32 to vector<8x8xf32>
    %58 = arith.mulf %56, %57 : vector<8x8xf32>
    %59 = vector.extract_strided_slice %45 {offsets = [0, 48], sizes = [8, 8], strides = [1, 1]} : vector<8x96xf32> to vector<8x8xf32>
    %60 = vector.extract_strided_slice %45 {offsets = [0, 80], sizes = [8, 8], strides = [1, 1]} : vector<8x96xf32> to vector<8x8xf32>
    %61 = vector.extract_strided_slice %45 {offsets = [0, 24], sizes = [8, 8], strides = [1, 1]} : vector<8x96xf32> to vector<8x8xf32>
    %cst_28 = arith.constant 0.353553385 : f32
    %62 = vector.broadcast %cst_28 : f32 to vector<8x8xf32>
    %63 = arith.mulf %61, %62 : vector<8x8xf32>
    %64 = vector.extract_strided_slice %45 {offsets = [0, 56], sizes = [8, 8], strides = [1, 1]} : vector<8x96xf32> to vector<8x8xf32>
    %65 = vector.extract_strided_slice %45 {offsets = [0, 88], sizes = [8, 8], strides = [1, 1]} : vector<8x96xf32> to vector<8x8xf32>
    %66 = vector.shape_cast %48 : vector<8x8xf32> to vector<1x8x8xf32>
    %67 = vector.shape_cast %53 : vector<8x8xf32> to vector<1x8x8xf32>
    %68 = vector.shape_cast %58 : vector<8x8xf32> to vector<1x8x8xf32>
    %69 = vector.shape_cast %63 : vector<8x8xf32> to vector<1x8x8xf32>
    %70 = tpu.concatenate %66, %67, %68, %69 in 0 : vector<1x8x8xf32>, vector<1x8x8xf32>, vector<1x8x8xf32>, vector<1x8x8xf32> -> vector<4x8x8xf32>
    %71 = arith.truncf %70 : vector<4x8x8xf32> to vector<4x8x8xbf16>
    %72 = vector.shape_cast %49 : vector<8x8xf32> to vector<1x8x8xf32>
    %73 = vector.shape_cast %54 : vector<8x8xf32> to vector<1x8x8xf32>
    %74 = vector.shape_cast %59 : vector<8x8xf32> to vector<1x8x8xf32>
    %75 = vector.shape_cast %64 : vector<8x8xf32> to vector<1x8x8xf32>
    %76 = tpu.concatenate %72, %73, %74, %75 in 0 : vector<1x8x8xf32>, vector<1x8x8xf32>, vector<1x8x8xf32>, vector<1x8x8xf32> -> vector<4x8x8xf32>
    %77 = arith.truncf %76 : vector<4x8x8xf32> to vector<4x8x8xbf16>
    %78 = vector.shape_cast %50 : vector<8x8xf32> to vector<1x8x8xf32>
    %79 = vector.shape_cast %55 : vector<8x8xf32> to vector<1x8x8xf32>
    %80 = vector.shape_cast %60 : vector<8x8xf32> to vector<1x8x8xf32>
    %81 = vector.shape_cast %65 : vector<8x8xf32> to vector<1x8x8xf32>
    %82 = tpu.concatenate %78, %79, %80, %81 in 0 : vector<1x8x8xf32>, vector<1x8x8xf32>, vector<1x8x8xf32>, vector<1x8x8xf32> -> vector<4x8x8xf32>
    %83 = arith.truncf %82 : vector<4x8x8xf32> to vector<4x8x8xbf16>
    "tpu.trace_start"() <{level = 10 : i32, message = "hqd,hkd->hqk"}> : () -> ()
    %cst_29 = arith.constant dense<0.000000e+00> : vector<4x8x8xf32>
    %84 = tpu.matmul %71, %77, %cst_29 {dimension_numbers = #tpu.dot_dimension_numbers<[2], [2], [1], [1], [0, 0, 0, 1, 1, 1], [0], [0]>} : vector<4x8x8xbf16>, vector<4x8x8xbf16>, vector<4x8x8xf32> -> vector<4x8x8xf32>
    "tpu.trace_stop"() : () -> ()
    %85 = vector.shape_cast %10 : vector<1x8xf32> to vector<1x1x8xf32>
    %86 = vector.broadcast %85 : vector<1x1x8xf32> to vector<4x8x8xf32>
    %87 = arith.addf %84, %86 : vector<4x8x8xf32>
    %cst_30 = arith.constant dense<0xFF800000> : vector<4x8xf32>
    %88 = vector.multi_reduction <maximumf>, %87, %cst_30 [2] : vector<4x8x8xf32> to vector<4x8xf32>
    %89 = vector.shape_cast %88 : vector<4x8xf32> to vector<4x8x1xf32>
    %90 = vector.broadcast %89 : vector<4x8x1xf32> to vector<4x8x8xf32>
    %91 = arith.subf %87, %90 : vector<4x8x8xf32>
    %92 = math.exp %91 : vector<4x8x8xf32>
    %cst_31 = arith.constant dense<0.000000e+00> : vector<4x8xf32>
    %93 = vector.multi_reduction <add>, %92, %cst_31 [2] : vector<4x8x8xf32> to vector<4x8xf32>
    %94 = vector.shape_cast %93 : vector<4x8xf32> to vector<4x8x1xf32>
    %95 = tpu.reciprocal %94 {approx = true} : vector<4x8x1xf32> -> vector<4x8x1xf32>
    %96 = vector.broadcast %95 : vector<4x8x1xf32> to vector<4x8x8xf32>
    %97 = arith.mulf %92, %96 : vector<4x8x8xf32>
    %98 = arith.truncf %97 : vector<4x8x8xf32> to vector<4x8x8xbf16>
    "tpu.trace_start"() <{level = 10 : i32, message = "hqk,hkd->hqd"}> : () -> ()
    %cst_32 = arith.constant dense<0.000000e+00> : vector<4x8x8xf32>
    %99 = tpu.matmul %98, %83, %cst_32 {dimension_numbers = #tpu.dot_dimension_numbers<[2], [1], [1], [2], [0, 0, 0, 1, 1, 2], [0], [0]>} : vector<4x8x8xbf16>, vector<4x8x8xbf16>, vector<4x8x8xf32> -> vector<4x8x8xf32>
    "tpu.trace_stop"() : () -> ()
    %100 = vector.extract_strided_slice %99 {offsets = [0, 0, 0], sizes = [1, 8, 8], strides = [1, 1, 1]} : vector<4x8x8xf32> to vector<1x8x8xf32>
    %101 = vector.shape_cast %100 : vector<1x8x8xf32> to vector<8x8xf32>
    %102 = vector.extract_strided_slice %99 {offsets = [1, 0, 0], sizes = [1, 8, 8], strides = [1, 1, 1]} : vector<4x8x8xf32> to vector<1x8x8xf32>
    %103 = vector.shape_cast %102 : vector<1x8x8xf32> to vector<8x8xf32>
    %104 = vector.extract_strided_slice %99 {offsets = [2, 0, 0], sizes = [1, 8, 8], strides = [1, 1, 1]} : vector<4x8x8xf32> to vector<1x8x8xf32>
    %105 = vector.shape_cast %104 : vector<1x8x8xf32> to vector<8x8xf32>
    %106 = vector.extract_strided_slice %99 {offsets = [3, 0, 0], sizes = [1, 8, 8], strides = [1, 1, 1]} : vector<4x8x8xf32> to vector<1x8x8xf32>
    %107 = vector.shape_cast %106 : vector<1x8x8xf32> to vector<8x8xf32>
    %108 = tpu.concatenate %101, %103, %105, %107 in 1 : vector<8x8xf32>, vector<8x8xf32>, vector<8x8xf32>, vector<8x8xf32> -> vector<8x32xf32>
    %109 = arith.truncf %108 : vector<8x32xf32> to vector<8x32xbf16>
    %c0_33 = arith.constant 0 : index
    %c0_34 = arith.constant 0 : index
    %c0_35 = arith.constant 0 : index
    %110 = vector.load %arg8[%c0_33, %c0_34, %c0_35] : memref<1x32x32xbf16, #tpu.memory_space<vmem>>, vector<1x32x32xbf16>
    %111 = vector.shape_cast %110 : vector<1x32x32xbf16> to vector<32x32xbf16>
    %cst_36 = arith.constant dense<0.000000e+00> : vector<8x32xf32>
    %112 = tpu.matmul %109, %111, %cst_36 {dimension_numbers = #tpu.dot_dimension_numbers<[1], [0], [0], [1], [0, 0, 1, 1], [], []>} : vector<8x32xbf16>, vector<32x32xbf16>, vector<8x32xf32> -> vector<8x32xf32>
    %c0_37 = arith.constant 0 : index
    %c0_38 = arith.constant 0 : index
    %c0_39 = arith.constant 0 : index
    %113 = vector.load %arg9[%c0_37, %c0_38, %c0_39] : memref<1x1x32xf32, #tpu.memory_space<vmem>>, vector<1x1x32xf32>
    %114 = vector.shape_cast %113 : vector<1x1x32xf32> to vector<1x32xf32>
    %115 = vector.broadcast %114 : vector<1x32xf32> to vector<8x32xf32>
    %116 = arith.addf %112, %115 : vector<8x32xf32>
    %117 = arith.addf %3, %116 : vector<8x32xf32>
    %c0_40 = arith.constant 0 : index
    %c0_41 = arith.constant 0 : index
    %c0_42 = arith.constant 0 : index
    %118 = vector.load %arg10[%c0_40, %c0_41, %c0_42] : memref<1x1x32xf32, #tpu.memory_space<vmem>>, vector<1x1x32xf32>
    %119 = vector.shape_cast %118 : vector<1x1x32xf32> to vector<1x32xf32>
    %c0_43 = arith.constant 0 : index
    %c0_44 = arith.constant 0 : index
    %c0_45 = arith.constant 0 : index
    %120 = vector.load %arg11[%c0_43, %c0_44, %c0_45] : memref<1x1x32xf32, #tpu.memory_space<vmem>>, vector<1x1x32xf32>
    %121 = vector.shape_cast %120 : vector<1x1x32xf32> to vector<1x32xf32>
    %cst_46 = arith.constant dense<0.000000e+00> : vector<8xf32>
    %122 = vector.multi_reduction <add>, %117, %cst_46 [1] : vector<8x32xf32> to vector<8xf32>
    %123 = vector.shape_cast %122 : vector<8xf32> to vector<8x1xf32>
    %cst_47 = arith.constant 3.200000e+01 : f32
    %124 = vector.broadcast %cst_47 : f32 to vector<8x1xf32>
    %125 = arith.divf %123, %124 : vector<8x1xf32>
    %126 = vector.broadcast %125 : vector<8x1xf32> to vector<8x32xf32>
    %127 = arith.subf %117, %126 : vector<8x32xf32>
    %128 = arith.mulf %127, %127 : vector<8x32xf32>
    %cst_48 = arith.constant dense<0.000000e+00> : vector<8xf32>
    %129 = vector.multi_reduction <add>, %128, %cst_48 [1] : vector<8x32xf32> to vector<8xf32>
    %130 = vector.shape_cast %129 : vector<8xf32> to vector<8x1xf32>
    %cst_49 = arith.constant 0.0322580636 : f32
    %131 = vector.broadcast %cst_49 : f32 to vector<8x1xf32>
    %132 = arith.mulf %130, %131 : vector<8x1xf32>
    %133 = math.sqrt %132 : vector<8x1xf32>
    %cst_50 = arith.constant 9.99999997E-7 : f32
    %134 = vector.broadcast %cst_50 : f32 to vector<8x1xf32>
    %135 = arith.addf %133, %134 : vector<8x1xf32>
    %136 = tpu.reciprocal %135 {approx = true} : vector<8x1xf32> -> vector<8x1xf32>
    %137 = vector.broadcast %125 : vector<8x1xf32> to vector<8x32xf32>
    %138 = arith.subf %117, %137 : vector<8x32xf32>
    %139 = vector.broadcast %119 : vector<1x32xf32> to vector<8x32xf32>
    %140 = arith.mulf %139, %138 : vector<8x32xf32>
    %141 = vector.broadcast %136 : vector<8x1xf32> to vector<8x32xf32>
    %142 = arith.mulf %140, %141 : vector<8x32xf32>
    %143 = vector.broadcast %121 : vector<1x32xf32> to vector<8x32xf32>
    %144 = arith.addf %142, %143 : vector<8x32xf32>
    %145 = arith.truncf %144 : vector<8x32xf32> to vector<8x32xbf16>
    %c0_51 = arith.constant 0 : index
    %c0_52 = arith.constant 0 : index
    %c0_53 = arith.constant 0 : index
    %146 = vector.load %arg12[%c0_51, %c0_52, %c0_53] : memref<1x32x64xbf16, #tpu.memory_space<vmem>>, vector<1x32x64xbf16>
    %147 = vector.shape_cast %146 : vector<1x32x64xbf16> to vector<32x64xbf16>
    %cst_54 = arith.constant dense<0.000000e+00> : vector<8x64xf32>
    %148 = tpu.matmul %145, %147, %cst_54 {dimension_numbers = #tpu.dot_dimension_numbers<[1], [0], [0], [1], [0, 0, 1, 1], [], []>} : vector<8x32xbf16>, vector<32x64xbf16>, vector<8x64xf32> -> vector<8x64xf32>
    %c0_55 = arith.constant 0 : index
    %c0_56 = arith.constant 0 : index
    %c0_57 = arith.constant 0 : index
    %149 = vector.load %arg13[%c0_55, %c0_56, %c0_57] : memref<1x1x64xf32, #tpu.memory_space<vmem>>, vector<1x1x64xf32>
    %150 = vector.shape_cast %149 : vector<1x1x64xf32> to vector<1x64xf32>
    %151 = vector.broadcast %150 : vector<1x64xf32> to vector<8x64xf32>
    %152 = arith.addf %148, %151 : vector<8x64xf32>
    %cst_58 = arith.constant 0.000000e+00 : f32
    %153 = vector.broadcast %cst_58 : f32 to vector<8x64xf32>
    %154 = arith.maximumf %152, %153 : vector<8x64xf32>
    %155 = arith.truncf %154 : vector<8x64xf32> to vector<8x64xbf16>
    %c0_59 = arith.constant 0 : index
    %c0_60 = arith.constant 0 : index
    %c0_61 = arith.constant 0 : index
    %156 = vector.load %arg14[%c0_59, %c0_60, %c0_61] : memref<1x64x32xbf16, #tpu.memory_space<vmem>>, vector<1x64x32xbf16>
    %157 = vector.shape_cast %156 : vector<1x64x32xbf16> to vector<64x32xbf16>
    %cst_62 = arith.constant dense<0.000000e+00> : vector<8x32xf32>
    %158 = tpu.matmul %155, %157, %cst_62 {dimension_numbers = #tpu.dot_dimension_numbers<[1], [0], [0], [1], [0, 0, 1, 1], [], []>} : vector<8x64xbf16>, vector<64x32xbf16>, vector<8x32xf32> -> vector<8x32xf32>
    %c0_63 = arith.constant 0 : index
    %c0_64 = arith.constant 0 : index
    %c0_65 = arith.constant 0 : index
    %159 = vector.load %arg15[%c0_63, %c0_64, %c0_65] : memref<1x1x32xf32, #tpu.memory_space<vmem>>, vector<1x1x32xf32>
    %160 = vector.shape_cast %159 : vector<1x1x32xf32> to vector<1x32xf32>
    %161 = vector.broadcast %160 : vector<1x32xf32> to vector<8x32xf32>
    %162 = arith.addf %158, %161 : vector<8x32xf32>
    %163 = arith.addf %117, %162 : vector<8x32xf32>
    %c0_66 = arith.constant 0 : index
    %c0_67 = arith.constant 0 : index
    %164 = vector.load %arg19[%c0_66, %c0_67] : memref<8x32xf32, #tpu.memory_space<vmem>>, vector<8x32xf32>
    tpu.vector_store %arg19[%c0_66, %c0_67], %163 {strides = array<i32>} : memref<8x32xf32, #tpu.memory_space<vmem>>, vector<8x32xf32>,
    %c1_i32 = arith.constant 1 : i32
    %165 = arith.cmpi eq, %arg1, %c1_i32 : i32
    %166 = arith.extui %165 : i1 to i32
    %c0_i32_68 = arith.constant 0 : i32
    %167 = arith.cmpi ne, %166, %c0_i32_68 : i32
    scf.if %167 {
      %c0_69 = arith.constant 0 : index
      %c0_70 = arith.constant 0 : index
      %168 = vector.load %arg16[%c0_69, %c0_70] : memref<1x32xf32, #tpu.memory_space<vmem>>, vector<1x32xf32>
      %c0_71 = arith.constant 0 : index
      %c0_72 = arith.constant 0 : index
      %169 = vector.load %arg17[%c0_71, %c0_72] : memref<1x32xf32, #tpu.memory_space<vmem>>, vector<1x32xf32>
      %cst_73 = arith.constant dense<0.000000e+00> : vector<8xf32>
      %170 = vector.multi_reduction <add>, %163, %cst_73 [1] : vector<8x32xf32> to vector<8xf32>
      %171 = vector.shape_cast %170 : vector<8xf32> to vector<8x1xf32>
      %cst_74 = arith.constant 3.200000e+01 : f32
      %172 = vector.broadcast %cst_74 : f32 to vector<8x1xf32>
      %173 = arith.divf %171, %172 : vector<8x1xf32>
      %174 = vector.broadcast %173 : vector<8x1xf32> to vector<8x32xf32>
      %175 = arith.subf %163, %174 : vector<8x32xf32>
      %176 = arith.mulf %175, %175 : vector<8x32xf32>
      %cst_75 = arith.constant dense<0.000000e+00> : vector<8xf32>
      %177 = vector.multi_reduction <add>, %176, %cst_75 [1] : vector<8x32xf32> to vector<8xf32>
      %178 = vector.shape_cast %177 : vector<8xf32> to vector<8x1xf32>
      %cst_76 = arith.constant 0.0322580636 : f32
      %179 = vector.broadcast %cst_76 : f32 to vector<8x1xf32>
      %180 = arith.mulf %178, %179 : vector<8x1xf32>
      %181 = math.sqrt %180 : vector<8x1xf32>
      %cst_77 = arith.constant 9.99999997E-7 : f32
      %182 = vector.broadcast %cst_77 : f32 to vector<8x1xf32>
      %183 = arith.addf %181, %182 : vector<8x1xf32>
      %184 = tpu.reciprocal %183 {approx = true} : vector<8x1xf32> -> vector<8x1xf32>
      %185 = vector.broadcast %173 : vector<8x1xf32> to vector<8x32xf32>
      %186 = arith.subf %163, %185 : vector<8x32xf32>
      %187 = vector.broadcast %168 : vector<1x32xf32> to vector<8x32xf32>
      %188 = arith.mulf %187, %186 : vector<8x32xf32>
      %189 = vector.broadcast %184 : vector<8x1xf32> to vector<8x32xf32>
      %190 = arith.mulf %188, %189 : vector<8x32xf32>
      %191 = vector.broadcast %169 : vector<1x32xf32> to vector<8x32xf32>
      %192 = arith.addf %190, %191 : vector<8x32xf32>
      %193 = vector.shape_cast %192 : vector<8x32xf32> to vector<1x8x32xf32>
      %c0_78 = arith.constant 0 : index
      %c0_79 = arith.constant 0 : index
      %c0_80 = arith.constant 0 : index
      %194 = vector.load %arg18[%c0_78, %c0_79, %c0_80] : memref<1x8x32xf32, #tpu.memory_space<vmem>>, vector<1x8x32xf32>
      tpu.vector_store %arg18[%c0_78, %c0_79, %c0_80], %193 {strides = array<i32>} : memref<1x8x32xf32, #tpu.memory_space<vmem>>, vector<1x8x32xf32>,
    } else {
    }
    return
  }
  func.func @transform_0(%arg0: i32, %arg1: i32) -> (i32, i32, i32) {
    %c0_i32 = arith.constant 0 : i32
    %c0_i32_0 = arith.constant 0 : i32
    %c0_i32_1 = arith.constant 0 : i32
    return %arg0, %c0_i32, %c0_i32_0 : i32, i32, i32
  }
  func.func @transform_1(%arg0: i32, %arg1: i32) -> (i32, i32, i32) {
    %c0_i32 = arith.constant 0 : i32
    %c0_i32_0 = arith.constant 0 : i32
    %c0_i32_1 = arith.constant 0 : i32
    return %arg0, %c0_i32, %c0_i32_0 : i32, i32, i32
  }
  func.func @transform_2(%arg0: i32, %arg1: i32) -> (i32, i32, i32) {
    %c0_i32 = arith.constant 0 : i32
    %c0_i32_0 = arith.constant 0 : i32
    %c0_i32_1 = arith.constant 0 : i32
    return %arg1, %c0_i32, %c0_i32_0 : i32, i32, i32
  }
  func.func @transform_3(%arg0: i32, %arg1: i32) -> (i32, i32, i32) {
    %c0_i32 = arith.constant 0 : i32
    %c0_i32_0 = arith.constant 0 : i32
    %c0_i32_1 = arith.constant 0 : i32
    return %arg1, %c0_i32, %c0_i32_0 : i32, i32, i32
  }
  func.func @transform_4(%arg0: i32, %arg1: i32) -> (i32, i32, i32) {
    %c0_i32 = arith.constant 0 : i32
    %c0_i32_0 = arith.constant 0 : i32
    %c0_i32_1 = arith.constant 0 : i32
    return %arg1, %c0_i32, %c0_i32_0 : i32, i32, i32
  }
  func.func @transform_5(%arg0: i32, %arg1: i32) -> (i32, i32, i32) {
    %c0_i32 = arith.constant 0 : i32
    %c0_i32_0 = arith.constant 0 : i32
    %c0_i32_1 = arith.constant 0 : i32
    return %arg1, %c0_i32, %c0_i32_0 : i32, i32, i32
  }
  func.func @transform_6(%arg0: i32, %arg1: i32) -> (i32, i32, i32) {
    %c0_i32 = arith.constant 0 : i32
    %c0_i32_0 = arith.constant 0 : i32
    %c0_i32_1 = arith.constant 0 : i32
    return %arg1, %c0_i32, %c0_i32_0 : i32, i32, i32
  }
  func.func @transform_7(%arg0: i32, %arg1: i32) -> (i32, i32, i32) {
    %c0_i32 = arith.constant 0 : i32
    %c0_i32_0 = arith.constant 0 : i32
    %c0_i32_1 = arith.constant 0 : i32
    return %arg1, %c0_i32, %c0_i32_0 : i32, i32, i32
  }
  func.func @transform_8(%arg0: i32, %arg1: i32) -> (i32, i32, i32) {
    %c0_i32 = arith.constant 0 : i32
    %c0_i32_0 = arith.constant 0 : i32
    %c0_i32_1 = arith.constant 0 : i32
    return %arg1, %c0_i32, %c0_i32_0 : i32, i32, i32
  }
  func.func @transform_9(%arg0: i32, %arg1: i32) -> (i32, i32, i32) {
    %c0_i32 = arith.constant 0 : i32
    %c0_i32_0 = arith.constant 0 : i32
    %c0_i32_1 = arith.constant 0 : i32
    return %arg1, %c0_i32, %c0_i32_0 : i32, i32, i32
  }
  func.func @transform_10(%arg0: i32, %arg1: i32) -> (i32, i32, i32) {
    %c0_i32 = arith.constant 0 : i32
    %c0_i32_0 = arith.constant 0 : i32
    %c0_i32_1 = arith.constant 0 : i32
    return %arg1, %c0_i32, %c0_i32_0 : i32, i32, i32
  }
  func.func @transform_11(%arg0: i32, %arg1: i32) -> (i32, i32, i32) {
    %c0_i32 = arith.constant 0 : i32
    %c0_i32_0 = arith.constant 0 : i32
    %c0_i32_1 = arith.constant 0 : i32
    return %arg1, %c0_i32, %c0_i32_0 : i32, i32, i32
  }
  func.func @transform_12(%arg0: i32, %arg1: i32) -> (i32, i32, i32) {
    %c0_i32 = arith.constant 0 : i32
    %c0_i32_0 = arith.constant 0 : i32
    %c0_i32_1 = arith.constant 0 : i32
    return %arg1, %c0_i32, %c0_i32_0 : i32, i32, i32
  }
  func.func @transform_13(%arg0: i32, %arg1: i32) -> (i32, i32, i32) {
    %c0_i32 = arith.constant 0 : i32
    %c0_i32_0 = arith.constant 0 : i32
    %c0_i32_1 = arith.constant 0 : i32
    return %arg1, %c0_i32, %c0_i32_0 : i32, i32, i32
  }
  func.func @transform_14(%arg0: i32, %arg1: i32) -> (i32, i32) {
    %c0_i32 = arith.constant 0 : i32
    %c0_i32_0 = arith.constant 0 : i32
    %c0_i32_1 = arith.constant 0 : i32
    return %c0_i32, %c0_i32_0 : i32, i32
  }
  func.func @transform_15(%arg0: i32, %arg1: i32) -> (i32, i32) {
    %c0_i32 = arith.constant 0 : i32
    %c0_i32_0 = arith.constant 0 : i32
    %c0_i32_1 = arith.constant 0 : i32
    return %c0_i32, %c0_i32_0 : i32, i32
  }
  func.func @transform_16(%arg0: i32, %arg1: i32) -> (i32, i32, i32) {
    %c0_i32 = arith.constant 0 : i32
    %c0_i32_0 = arith.constant 0 : i32
    %c0_i32_1 = arith.constant 0 : i32
    return %arg0, %c0_i32, %c0_i32_0 : i32, i32, i32
  }
}

</mosaic_0001>

<bundles_post_ra>
// kernel: tpu_custom_call.1
= control target key start
LH: loop header
LB: loop body
LE: loop exit
PB: predicated region body
PF: predicated region fallthrough
CT: control target
= control target key end

     0   :  { %s3154_s0 = inlined_call_operand.hbm [shape: f32[2,8,32], index: 0, kind: input, shape index: {}]   ;;  %s3155_s1 = inlined_call_operand.vmem [shape: f32[2,1,8], index: 1, kind: input, shape index: {}]   ;;  %s3156_s2 = inlined_call_operand.vmem [shape: f32[2,1,32], index: 2, kind: input, shape index: {}]   ;;  %s3157_s3 = inlined_call_operand.vmem [shape: f32[2,1,32], index: 3, kind: input, shape index: {}]   ;;  %s3158_s4 = inlined_call_operand.vmem [shape: bf16[2,32,96], index: 4, kind: input, shape index: {}]   ;;  %s3159_s5 = inlined_call_operand.vmem [shape: f32[2,1,96], index: 5, kind: input, shape index: {}]   ;;  %s3160_s6 = inlined_call_operand.vmem [shape: bf16[2,32,32], index: 6, kind: input, shape index: {}]   ;;  %s3161_s7 = inlined_call_operand.vmem [shape: f32[2,1,32], index: 7, kind: input, shape index: {}]   ;;  %s3162_s8 = inlined_call_operand.vmem [shape: f32[2,1,32], index: 8, kind: input, shape index: {}]   ;;  %s3163_s9 = inlined_call_operand.hbm [shape: f32[2,1,32], index: 9, kind: input, shape index: {}]   ;;  %s3164_s10 = inlined_call_operand.vmem [shape: bf16[2,32,64], index: 10, kind: input, shape index: {}]   ;;  %s3165_s11 = inlined_call_operand.hbm [shape: f32[2,1,64], index: 11, kind: input, shape index: {}]   ;;  %s3166_s12 = inlined_call_operand.vmem [shape: bf16[2,64,32], index: 12, kind: input, shape index: {}]   ;;  %s3167_s13 = inlined_call_operand.vmem [shape: f32[2,1,32], index: 13, kind: input, shape index: {}]   ;;  %s3168_s14 = inlined_call_operand.vmem [shape: f32[1,32], index: 14, kind: input, shape index: {}]   ;;  %s3169_s15 = inlined_call_operand.vmem [shape: f32[1,32], index: 15, kind: input, shape index: {}]   ;;  %s3170_s16 = inlined_call_operand.hbm [shape: f32[2,8,32], index: 16, kind: output, shape index: {}]  }
   0x1   :  { %3198 = sst [smem:[#allocation28_spill]] %s3154_s0 }
   0x2   :  { %3199 = sst [smem:[#allocation29_spill]] %s3155_s1 }
   0x3   :  { %3200 = sst [smem:[#allocation30_spill]] %s3156_s2 }
   0x4   :  { %3201 = sst [smem:[#allocation31_spill]] %s3157_s3 }
   0x5   :  { %3202 = sst [smem:[#allocation32_spill]] %s3158_s4 }
   0x6   :  { %3203 = sst [smem:[#allocation33_spill]] %s3159_s5 }
   0x7   :  { %3204 = sst [smem:[#allocation34_spill]] %s3160_s6 }
   0x8   :  { %3205 = sst [smem:[#allocation35_spill]] %s3161_s7 }
   0x9   :  { %3206 = sst [smem:[#allocation36_spill]] %s3162_s8 }
   0xa   :  { %3207 = sst [smem:[#allocation37_spill]] %s3163_s9 }
   0xb   :  { %3208 = sst [smem:[#allocation38_spill]] %s3164_s10 }
   0xc   :  { %3209 = sst [smem:[#allocation39_spill]] %s3165_s11 }
   0xd   :  { %3210 = sst [smem:[#allocation40_spill]] %s3166_s12 }
   0xe   :  { %3211 = sst [smem:[#allocation41_spill]] %s3167_s13 }
   0xf   :  { %3212 = sst [smem:[#allocation42_spill]] %s3168_s14 }
  0x10   :  { %3213 = sst [smem:[#allocation43_spill]] %s3169_s15 }
  0x11   :  { %3214 = sst [smem:[#allocation44_spill]] %s3170_s16 }
  0x12   :  { %21 = vsyncpa [#allocation4], 0 }
  0x13   :  { %23 = vsyncpa [#allocation4 + $0x1], 0 }
  0x14   :  { %24 = vsyncpa [#allocation7], 0 }
  0x15   :  { %26 = vsyncpa [#allocation7 + $0x1], 0 }
  0x16   :  { %27 = vsyncpa [#allocation5], 0 }
  0x17   :  { %29 = vsyncpa [#allocation5 + $0x1], 0  ;;  %s2593_s21 = smov 0   ;;  %s2595_s22 = smov 0  }
  0x18   :  { %s2597_s23 = smov 0   ;;  %s2599_s24 = smov 0  }
  0x19   :  { %s2601_s25 = smov 0   ;;  %s2603_s26 = smov 0  }
  0x1a   :  { %s2605_s27 = smov 0   ;;  %s2607_s28 = smov 0  }
  0x1b   :  { %s2609_s29 = smov 0   ;;  %s2611_s30 = smov 0  }
  0x1c   :  { %s2613_s0 = smov 0  }
  0x1d LB: > { %3215 = sst [smem:[#allocation13_spill]] %s2456_s22  ;;  %s2647_s17 = sadd.s32 4294967295, %s2492_s0   ;;  %s2492_s0 = sphi %s2613_s0, %s35_s0   ;;  %s2488_s30 = sphi %s2611_s30, %s3296_s30   ;;  %s2484_s29 = sphi %s2609_s29, %s3295_s29   ;;  %s2480_s28 = sphi %s2607_s28, %s3294_s28   ;;  %s2476_s27 = sphi %s2605_s27, %s3293_s27   ;;  %s2472_s26 = sphi %s2603_s26, %s3292_s26   ;;  %s2468_s25 = sphi %s2601_s25, %s3291_s25   ;;  %s2464_s24 = sphi %s2599_s24, %s3290_s24   ;;  %s2460_s23 = sphi %s2597_s23, %s3289_s23   ;;  %s2456_s22 = sphi %s2595_s22, %s3288_s22   ;;  %s2452_s21 = sphi %s2593_s21, %s3287_s21  }
  0x1e   : > { %3216 = sst [smem:[#allocation14_spill]] %s2460_s23  ;;  %s44_s18 = sadd.s32 1, %s2484_s29 }
  0x1f   : > { %3217 = sst [smem:[#allocation15_spill]] %s2464_s24  ;;  %p2650_p0 = scmp.ge.s32.totalorder %s44_s18, 2 }
  0x20   : > { %3218 = sst [smem:[#allocation16_spill]] %s2468_s25  ;;  %p3178_p1 = scmp.eq.s32.totalorder %s2492_s0, 0 }
  0x21   : > { %3219 = sst [smem:[#allocation17_spill]] %s2472_s26  ;;  %p3177_p2 = scmp.eq.s32.totalorder %s2647_s17, 0 }
  0x22   : > { %3220 = sst [smem:[#allocation18_spill]] %s2484_s29  ;;  %s288_s20 = sadd.s32 1, %s2460_s23 }
  0x23   : > { %3221 = sst [smem:[#allocation19_spill]] %s2488_s30  ;;  %s3298_s18 = smov (%p2650_p0, %s44_s18), 0 }
  0x24   : > { %3222 = sst [smem:[#allocation20_spill]] %s2492_s0  ;;  %p295_p3 = scmp.ne.s32.totalorder %s2460_s23, %s2456_s22 }
  0x25   : > { %3224 = sst [smem:[#allocation21_spill]] %s3298_s18  ;;  %p301_p4 = scmp.ne.s32.totalorder %s2456_s22, %s2452_s21 }
  0x26   : > { %s285_s16 = ssub.s32 %s2484_s29, %s3298_s18  ;;  %p297_p6 = por %p295_p3, %p3178_p1 }
  0x27   : > { %p286_p5 = scmp.eq.s32.totalorder %s285_s16, 0  ;;  %p2670_p7 = por %p301_p4, %p3177_p2 }
  0x28   : > { %p3176_p8 = scmp.lt.s32.totalorder %s2492_s0, 4  ;;  %s573_s13 = sand.u32 1, %s2492_s0  }
  0x29   : > { %s3225_s15 = scalar_select %p2670_p7, 1, 0 }
  0x2a   : > { %s2676_s14 = scalar_select %p286_p5, %s2460_s23, %s288_s20  }
  0x2b   : > { %s3174_s12 = sand.u32 1, %s2460_s23   ;;  %s3175_s10 = sshll.u32 %s2484_s29, 4 }
  0x2c   : > { %3226 = sst [smem:[#allocation22_spill]] %s2676_s14  ;;  %s576_s8 = scalar_lea.vmem [#allocation6], %s3174_s12 }
  0x2d   : > { %s583_s7 = sshll.u32 %s576_s8, 4  ;;  %s3227_s9 = sld [smem:[#allocation37_spill]]  ;;  %s2690_s7 = int_to_ptr.vmem [resolvable:$true] %s583_s7 }
  0x2e   : > { %p2694_p9 = pnand %p3176_p8, %p297_p6  ;;  %s2700_s8 = scalar_lea.sflag [#allocation7], %s573_s13 }
  0x30   : > { %p3185_p13 = pneg %p2694_p9 }
  0x33   : > { %s2688_s16 = scalar_lea.hbm %s3227_s9, %s3175_s10  ;;  %s2281_s10 = scalar_lea.hbm %s3227_s9, 32 }
  0x34   : > { %s2276_s18 = scalar_lea.hbm %s2688_s16, 16  ;;  %p2282_p5 = scmp.lt.u32.totalorder %s2688_s16, %s3227_s9 }
  0x35   : > { %p2277_p12 = scmp.ne.s32.totalorder %s2688_s16, %s2276_s18  ;;  %p2283_p6 = scmp.lt.u32.totalorder %s2281_s10, %s2276_s18 }
  0x36   : > { %p2285_p2 = scmp.lt.u32.totalorder %s2276_s18, %s2688_s16 }
  0x37   : > { %p2279_p3 = pnand %p3185_p13, %p2277_p12  ;;  %p2284_p8 = por %p2283_p6, %p2282_p5 }
  0x39   : > { %p2280_p4 = pneg %p2279_p3  ;;  %p2286_p1 = por %p2285_p2, %p2284_p8 }
  0x3b   : > { %p2287_p10 = pnand %p2286_p1, %p2280_p4 }
  0x3d   : > { %2290 = shalt.err (!%p2287_p10)
}
  0x3e   : > { %s2291_s13 = scalar_lea.vmem %s2690_s7, 16  ;;  %s2494_s12 = smov [#allocation6]  }
  0x3f   : > { %p2292_p12 = scmp.ne.s32.totalorder %s2690_s7, %s2291_s13  ;;  %s2296_s21 = sshll.u32 %s2494_s12, 4  ;;  %s2297_s21 = int_to_ptr.vmem [resolvable:$false] %s2296_s21 }
  0x40   : > { %s2298_s6 = scalar_lea.vmem %s2297_s21, 32  ;;  %p2299_p7 = scmp.lt.s32.totalorder %s2690_s7, %s2297_s21 }
  0x41   : > { %p2294_p3 = pnand %p2292_p12, %p3185_p13  ;;  %p2300_p5 = scmp.lt.s32.totalorder %s2298_s6, %s2291_s13 }
  0x43   : > { %p2295_p11 = pneg %p2294_p3  ;;  %p2301_p6 = por %p2300_p5, %p2299_p7 }
  0x45   : > { %p2302_p2 = pnand %p2301_p6, %p2295_p11 }
  0x47   : > { %2305 = shalt.err (!%p2302_p2)
}
  0x48   : > { %2130 = dma.hbm_to_vmem [thread:$0]  (!%p2694_p9), %s2688_s16, 16, %s2690_s7, %s2700_s8  }
  0x49   : > { %p3229_p1 = scmp.lt.s32.totalorder %s2492_s0, 5  ;;  %p3230_p7 = scmp.ge.s32.totalorder %s2492_s0, 1 }
  0x4a   : > { %s1942_s14 = sadd.s32 4294967294, %s2492_s0   ;;  %s47_s18 = sadd.s32 1, %s2488_s30 }
  0x4b   : > { %p2732_p8 = pnand %p3230_p7, %p3229_p1  ;;  %s54_s13 = sadd.s32 1, %s2472_s26 }
  0x4c   : > { %s3300_s18 = smov (!%p2650_p0, %s47_s18), %s2488_s30  ;;  %p61_p10 = scmp.ne.s32.totalorder %s2472_s26, %s2468_s25 }
  0x4d   : > { %s3231_s10 = scalar_select %p2732_p8, 1, 0 }
  0x4e   : > { %p67_p11 = scmp.ne.s32.totalorder %s2468_s25, %s2464_s24  ;;  %p49_p4 = scmp.ge.s32.totalorder %s3300_s18, 2 }
  0x4f   : > { %p471_p12 = scmp.eq.s32.totalorder %s2647_s17, 3  ;;  %p3232_p3 = scmp.eq.s32.totalorder %s2492_s0, 0 }
  0x50   : > { %p3234_p6 = scmp.eq.s32.totalorder %s2647_s17, 0  ;;  %s3302_s18 = smov (%p49_p4, %s3300_s18), 0 }
  0x51   : > { %p2749_p5 = por %p3232_p3, %p61_p10  ;;  %3236 = sst [smem:[#allocation23_spill]] %s3302_s18 }
  0x52   : > { %p2755_p2 = por %p3234_p6, %p67_p11  ;;  %p2761_p0 = por %p471_p12, %p61_p10 }
  0x53   : > { %p477_p1 = scmp.eq.s32.totalorder %s1942_s14, 3  ;;  %s51_s12 = ssub.s32 %s2488_s30, %s3302_s18 }
  0x54   : > { %s3235_s16 = scalar_select %p2755_p2, 1, 0 }
  0x55   : > { %s3237_s19 = scalar_select %p2761_p0, 1, 0 }
  0x56   : > { %s503_s21 = sand.u32 1, %s2472_s26   ;;  %p52_p7 = scmp.eq.s32.totalorder %s51_s12, 0 }
  0x57   : > { %3238 = sst [smem:[#allocation24_spill]] %s3237_s19  ;;  %p2768_p3 = por %p477_p1, %p67_p11 }
  0x58   : > { %s1945_s9 = sshll.u32 %s503_s21, 3  ;;  %s1946_s4 = sshll.u32 %s2488_s30, 7 }
  0x59   : > { %s3239_s6 = scalar_select %p2768_p3, 1, 0 }
  0x5a   : > { %s2773_s24 = scalar_select %p52_p7, %s2472_s26, %s54_s13  }
  0x5b   : > { %3240 = sst [smem:[#allocation25_spill]] %s3239_s6  ;;  %s3242_s2 = sld [smem:[#allocation28_spill]] }
  0x5c   : > { %3241 = sst [smem:[#allocation26_spill]] %s2773_s24  ;;  %s507_s14 = scalar_lea.vmem [#allocation3], %s1945_s9 }
  0x5d   : > { %s514_s18 = sshll.u32 %s507_s14, 4  ;;  %p3243_p10 = scmp.lt.s32.totalorder %s2492_s0, 4  ;;  %s2781_s18 = int_to_ptr.vmem [resolvable:$true] %s514_s18 }
  0x5e   : > { %s3245_s13 = sshll.u32 %s2484_s29, 4  ;;  %s3246_s11 = sld [smem:[#allocation39_spill]] }
  0x5f   : > { %p2787_p11 = pnand %p3243_p10, %p2749_p5  ;;  %s504_s7 = scalar_lea.sflag [#allocation4], %s503_s21 }
  0x61   : > { %s2779_s1 = scalar_lea.hbm %s3242_s2, %s1946_s4  ;;  %s3247_s4 = sand.u32 1, %s2460_s23  }
  0x62   : > { %s601_s5 = scalar_lea.vmem [#allocation8], %s3247_s4  ;;  %s2306_s14 = scalar_lea.hbm %s2779_s1, 128 }
  0x63   : > { %s608_s9 = sshll.u32 %s601_s5, 4  ;;  %p2307_p4 = scmp.ne.s32.totalorder %s2779_s1, %s2306_s14  ;;  %s2800_s9 = int_to_ptr.vmem [resolvable:$true] %s608_s9 }
  0x64   : > { %s2796_s3 = scalar_lea.hbm %s3246_s11, %s3245_s13  ;;  %p2308_p12 = pneg %p2787_p11 }
  0x65   : > { %s2311_s30 = scalar_lea.hbm %s3242_s2, 256  ;;  %p2312_p1 = scmp.lt.u32.totalorder %s2779_s1, %s3242_s2 }
  0x66   : > { %p2309_p5 = pnand %p2308_p12, %p2307_p4  ;;  %p2313_p7 = scmp.lt.u32.totalorder %s2311_s30, %s2306_s14 }
  0x67   : > { %p2315_p13 = scmp.lt.u32.totalorder %s2306_s14, %s2779_s1 }
  0x68   : > { %p2310_p6 = pneg %p2309_p5  ;;  %p2314_p10 = por %p2313_p7, %p2312_p1 }
  0x6a   : > { %p2316_p3 = por %p2315_p13, %p2314_p10 }
  0x6c   : > { %p2317_p0 = pnand %p2316_p3, %p2310_p6 }
  0x6e   : > { %2320 = shalt.err (!%p2317_p0)
}
  0x6f   : > { %s2321_s21 = scalar_lea.vmem %s2781_s18, 128  ;;  %s2495_s29 = smov [#allocation3]  }
  0x70   : > { %p2322_p4 = scmp.ne.s32.totalorder %s2781_s18, %s2321_s21  ;;  %s2326_s4 = sshll.u32 %s2495_s29, 4  ;;  %s2327_s4 = int_to_ptr.vmem [resolvable:$false] %s2326_s4 }
  0x71   : > { %s2328_s26 = scalar_lea.vmem %s2327_s4, 256  ;;  %p2329_p8 = scmp.lt.s32.totalorder %s2781_s18, %s2327_s4 }
  0x72   : > { %p2324_p5 = pnand %p2322_p4, %p2308_p12  ;;  %p2330_p1 = scmp.lt.s32.totalorder %s2328_s26, %s2321_s21 }
  0x74   : > { %p2325_p2 = pneg %p2324_p5  ;;  %p2331_p7 = por %p2330_p1, %p2329_p8 }
  0x76   : > { %p2332_p13 = pnand %p2331_p7, %p2325_p2 }
  0x78   : > { %2335 = shalt.err (!%p2332_p13)
}
  0x79   : > { %2127 = dma.hbm_to_vmem [thread:$0]  (!%p2787_p11), %s2779_s1, 128, %s2781_s18, %s504_s7  }
  0x7a   : > { %s2336_s5 = scalar_lea.hbm %s2796_s3, 16  ;;  %p3248_p3 = pneg %p2694_p9 }
  0x7b   : > { %p2337_p0 = scmp.ne.s32.totalorder %s2796_s3, %s2336_s5  ;;  %s2341_s30 = scalar_lea.hbm %s3246_s11, 32 }
  0x7c   : > { %p2342_p8 = scmp.lt.u32.totalorder %s2796_s3, %s3246_s11  ;;  %p2343_p2 = scmp.lt.u32.totalorder %s2341_s30, %s2336_s5 }
  0x7d   : > { %p2339_p12 = pnand %p2337_p0, %p3248_p3  ;;  %p2345_p4 = scmp.lt.u32.totalorder %s2336_s5, %s2796_s3 }
  0x7e   : > { %p2344_p10 = por %p2343_p2, %p2342_p8 }
  0x7f   : > { %p2340_p6 = pneg %p2339_p12 }
  0x80   : > { %p2346_p5 = por %p2345_p4, %p2344_p10 }
  0x82   : > { %p2347_p1 = pnand %p2346_p5, %p2340_p6 }
  0x84   : > { %2350 = shalt.err (!%p2347_p1)
}
  0x85   : > { %s2351_s1 = scalar_lea.vmem %s2800_s9, 16  ;;  %p3249_p7 = pmov %p3248_p3 }
  0x86   : > { %p2352_p11 = scmp.ne.s32.totalorder %s2800_s9, %s2351_s1  ;;  %s2496_s18 = smov [#allocation8]  }
  0x87   : > { %s2356_s7 = sshll.u32 %s2496_s18, 4  ;;  %s2357_s7 = int_to_ptr.vmem [resolvable:$false] %s2356_s7 }
  0x88   : > { %p2354_p13 = pnand %p2352_p11, %p3249_p7  ;;  %s2358_s21 = scalar_lea.vmem %s2357_s7, 32 }
  0x89   : > { %p2359_p3 = scmp.lt.s32.totalorder %s2800_s9, %s2357_s7  ;;  %p2360_p12 = scmp.lt.s32.totalorder %s2358_s21, %s2351_s1 }
  0x8a   : > { %p2355_p0 = pneg %p2354_p13 }
  0x8b   : > { %p2361_p8 = por %p2360_p12, %p2359_p3 }
  0x8d   : > { %p2362_p2 = pnand %p2361_p8, %p2355_p0 }
  0x8f   : > { %2365 = shalt.err (!%p2362_p2)
}
  0x90   : > { %2133 = dma.hbm_to_vmem [thread:$0]  (!%p2694_p9), %s2796_s3, 16, %s2800_s9, %s2700_s8  }
  0x91   : > { %p3250_p6 = scmp.ne.s32.totalorder %s3231_s10, 0 }
  0x93   : > { %631 = sbr.rel (%p3250_p6) target bundleno = 3165 (0xc5d), region = 84 }
  0x9a   : > { %s2854_s29 = sand.u32 1, %s2468_s25   ;;  %p3252_p10 = scmp.ne.s32.totalorder %s3235_s16, 0 }
  0x9b   : > { %3251 = sst [smem:[#allocation27_spill]] %s2854_s29  ;;  %s1950_s4 = sshll.u32 %s2854_s29, 3 }
  0x9c   : > { %s634_s26 = scalar_lea.sflag [#allocation4], %s2854_s29  ;;  %s637_s5 = scalar_lea.vmem [#allocation3], %s1950_s4 }
  0x9d   : > { %2439 = dma.done.wait (%p3252_p10), %s634_s26, 128  }
  0x9e   : > { %2441 = vsyncadd (%p3252_p10), %s634_s26, 4294967168  ;;  %s642_s20 = sand.u32 1, %s2647_s17   ;;  %s644_s8 = sand.u32 1, %s2456_s22  }
  0x9f   : > { %s643_s10 = scalar_lea.sflag [#allocation7], %s642_s20  ;;  %s2864_s3 = scalar_lea.vmem [#allocation6], %s644_s8 }
  0xa0   : > { %p3253_p9 = scmp.ne.s32.totalorder %s3225_s15, 0 }
  0xa2   : > { %2443 = dma.done.wait (%p3253_p9), %s643_s10, 32  }
  0xa3   : > { %2445 = vsyncadd (%p3253_p9), %s643_s10, 4294967264  ;;  %p751_p4 = scmp.lt.s32.totalorder %s2480_s28, 1  ;;  %p754_p5 = scmp.lt.s32.totalorder %s2476_s27, 1 }
  0xa4   : > { %s3258_s23 = sld [smem:[#allocation32_spill]]  ;;  %s3259_s15 = sld [smem:[#allocation34_spill]] }
  0xa5   : > { %s2873_s16 = scalar_select %p751_p4, %s2480_s28, 1 }
  0xa6   : > { %s2876_s9 = scalar_select %p754_p5, %s2476_s27, 1 }
  0xa7   : > { %s3260_s12 = sld [smem:[#allocation35_spill]]  ;;  %s3261_s26 = sld [smem:[#allocation36_spill]] }
  0xa8   : > { %s1998_s20 = sshll.u32 %s2876_s9, 4  ;;  %s3262_s14 = sld [smem:[#allocation38_spill]] }
  0xa9   : > { %s2001_s11 = sshll.u32 %s2876_s9, 5  ;;  %s3263_s19 = sld [smem:[#allocation40_spill]] }
  0xaa   : > { %s2898_s22 = scalar_lea.vmem %s3258_s23, %s1998_s20  ;;  %s2903_s0 = scalar_lea.vmem %s3259_s15, %s1998_s20 }
  0xab   : > { %s3264_s29 = sld [smem:[#allocation41_spill]]  ;;  %s2928_s13 = scalar_lea.vmem [#allocation8], %s644_s8 }
  0xac   : > { %p1960_p1 = scmp.ne.s32.totalorder %s2476_s27, 0 }
  0xad   : > { %s775_s18 = scalar_lea.vmem %s3260_s12, %s2876_s9  ;;  %s778_s1 = scalar_lea.vmem %s3261_s26, %s2876_s9  ;;  %v797_v0 = vld [vmem:[%s637_s5] sm:$0xff] (!%p1960_p1)  ;;  %vm798_vm0 = vcmask (!%p1960_p1), 261120  }
  0xae   : > { %s2916_s2 = scalar_lea.vmem %s3262_s14, %s1998_s20  ;;  %s2930_s12 = scalar_lea.vmem [#allocation9], %s1950_s4  ;;  %799 = vst.msk [vmem:[#allocation2] sm:$0xff] (!%p1960_p1), %vm798_vm0, %v797_v0 }
  0xaf   : > { %s2922_s6 = scalar_lea.vmem %s3263_s19, %s2001_s11  ;;  %796 = sbr.rel (%p1960_p1) target bundleno = 182 (0xb6), region = 100 }
  0xb1   : > { %s791_s30 = scalar_lea.vmem %s3264_s29, %s2876_s9 }
  0xb6 PF: > { %v2933_v1 = vld [vmem:[#allocation2] sm:$0xff]  ;;  %vm806_vm1 = vcmask 261120   ;;  %v2497_v9 = vmov 0.0   ;;  %vm2498_vm2 = vmmov 0   ;;  %v2239_v10 = vld [vmem:[%s2898_s22 + $0x8] sm:$0xff]   ;;  %s3265_s29 = sld [smem:[#allocation30_spill]]  ;;  %v939_v55 = vlaneseq }
  0xb7   : > { %v807_v2 = vsel %vm806_vm1, %v2933_v1, 0.0  ;;  %v2238_v8 = vld [vmem:[%s2898_s22] sm:$0xff]   ;;  %2032 = vmatprep.subr.bf16.mxu0 %v2497_v9  ;;  %2036 = vmatprep.mubr.msk.bf16.mxu0 %vm2498_vm2, %v2497_v9  ;;  %s3267_s26 = sld [smem:[#allocation31_spill]]  ;;  %s3269_s10 = sld [smem:[#allocation33_spill]]  ;;  %vm947_vm5 = vcmask 64512   ;;  %vm1194_vm7 = vcmask 1043456  }
  0xb8   : > { %808 = vadd.xlane.f32.xlu0 %v807_v2  ;;  %2033 = vmatpush3.bf16.msra.mxu0 %v2238_v8  ;;  %s2499_s14 = smov 104   ;;  %s2500_s11 = smov 120   ;;  %v940_v57 = vshrl.u32 %v939_v55, 7  ;;  %vm1395_vm8 = vcmask 130048   ;;  %vm1397_vm9 = vcmask 195584   ;;  %vm1611_vm12 = vcmask 523264  }
  0xb9   : > { %2040 = vmatprep.subr.bf16.mxu1 %v2497_v9  ;;  %2034 = vmatprep.subr.bf16.mxu0 %v2497_v9  ;;  %s2501_s23 = smov 112   ;;  %s2502_s25 = smov 96  }
  0xba   : > { %2042 = vmatprep.mubr.msk.bf16.mxu1 %vm2498_vm2, %v2497_v9  ;;  %s3271_s22 = sld [smem:[#allocation29_spill]]  ;;  %v941_v58 = vsub.s32 0, %v940_v57  ;;  %s2506_s5 = smov 24  }
  0xbb   : > { %p1991_p11 = scmp.ne.s32.totalorder %s2476_s27, 1 }
  0xbc   : > { %2035 = vmatpush3.bf16.msra.mxu0 %v2239_v10  ;;  %s3266_s4 = scalar_lea.vmem %s3265_s29, %s2876_s9  ;;  %s2504_s29 = smov 8  }
  0xbd   : > { %2046 = vmatprep.subr.bf16.mxu0 %v2497_v9  ;;  %v1961_v19 = vld [vmem:[%s3266_s4] ss:$0 sm:$0xff]  ;;  %s3268_s20 = scalar_lea.vmem %s3267_s26, %s2876_s9  ;;  %s3270_s17 = scalar_lea.vmem %s3269_s10, %s2876_s9 }
  0xbe   : > { %v1962_v22 = vld [vmem:[%s3268_s20] ss:$0 sm:$0xff]  ;;  %s2505_s4 = smov 16   ;;  %s3277_s21 = sld [smem:[#allocation43_spill]] (!%p1991_p11) }
  0xbf   : > { %v1963_v26 = vld [vmem:[%s3270_s17] ss:$0 sm:$0xff] }
  0xc0   : > { %s3272_s19 = scalar_lea.vmem %s3271_s22, %s2873_s16  ;;  %s2503_s16 = smov 64  }
  0xc1   : > { %v801_v56 = vld [vmem:[%s3272_s19] sm:$0x1] }
  0xc2   : > { %vm802_vm6 = vcmp.eq.f32.partialorder %v801_v56, 0.0 }
  0xc3   : > { %v803_v59 = vsel %vm802_vm6, -1e+09, %v2497_v9 }
  0xc4   : > { %v942_v60 = vrot.slane %v803_v59, %v941_v58 }
 0x145   : > { %v809_v3 = vpop.xlane.xlu0 %808 }
 0x146   : > { %v811_v4 = vmul.f32 0.03125, %v809_v3 }
 0x148   : > { %v812_v5 = vsub.f32 %v2933_v1, %v811_v4 }
 0x14a   : > { %v813_v6 = vmul.f32 %v812_v5, %v812_v5  ;;  %v833_v20 = vmul.f32 %v1961_v19, %v812_v5 }
 0x14c   : > { %v814_v7 = vsel %vm806_vm1, %v813_v6, 0.0 }
 0x14d   : > { %815 = vadd.xlane.f32.xlu0 %v814_v7 }
 0x1da   : > { %v816_v11 = vpop.xlane.xlu0 %815 }
 0x1db   : > { %v817_v12 = vmul.f32 0.032258064, %v816_v11 }
 0x1dd   : > { %2248 = vrsqrt.f32 %v817_v12  ;;  %vm820_vm3 = vcmp.eq.f32.partialorder %v817_v12, inf  ;;  %v823_v15 = vand.u32 2147483648, %v817_v12  ;;  %vm822_vm4 = vcmp.eq.f32.partialorder %v817_v12, 0.0 }
 0x1e7   : > { %v2249_v13 = vpop.eup %2248 }
 0x1e8   : > { %v819_v14 = vmul.f32 %v2249_v13, %v817_v12 }
 0x1ea   : > { %v821_v16 = vsel %vm820_vm3, %v817_v12, %v819_v14 }
 0x1eb   : > { %v824_v17 = vsel %vm822_vm4, %v823_v15, %v821_v16 }
 0x1ec   : > { %v825_v18 = vadd.f32 1e-06, %v824_v17 }
 0x1ee   : > { %2250 = vrcp.f32 %v825_v18 }
 0x1f8   : > { %v2251_v21 = vpop.eup %2250 }
 0x1f9   : > { %v834_v23 = vmul.f32 %v2251_v21, %v833_v20 }
 0x1fb   : > { %v841_v24 = vadd.f32 %v1962_v22, %v834_v23 }
 0x1fd   : > { %v842_v25 = vpack.c.bf16 %v841_v24, %v841_v24 }
 0x1ff   : > { %2037 = vmatmul.mubr.msk.bf16.vlgmr.msra.gmra.mrb[0].mxu0 %vm806_vm1, %v842_v25 }
 0x200   : > { %2048 = vmatprep.mubr.msk.bf16.mxu0 %vm2498_vm2, %v2497_v9 }
 0x2d2   : > { %v903_v27 = vpop.f32.mrb[0].mxu0 }
 0x2d3   : > { %v904_v28 = vadd.f32 %v1963_v26, %v903_v27  ;;  %v2038_v29 = vpop.f32.mrb[1].mxu0 }
 0x2d4   : > { %v906_v30 = vpop.f32.mrb[2].mxu0 }
 0x2d5   : > { %931 = vrot.lane.b32.xlu0 %v904_v28, %s2499_s14  ;;  %925 = vrot.lane.b32.xlu1 %v904_v28, %s2500_s11  ;;  %v2039_v31 = vpop.f32.mrb[3].mxu0  ;;  %v909_v32 = vmul.f32 0.35355338, %v904_v28  ;;  %v2967_v33 = vpack.c.bf16 %v904_v28, %v904_v28 }
 0x2d7   : > { %v920_v42 = vpack.c.bf16 %v909_v32, %v909_v32 }
 0x2d9   : > { %928 = vrot.lane.b32.xlu1 %v904_v28, %s2501_s23  ;;  %917 = vrot.lane.b32.xlu0 %v909_v32, %s2499_s14 }
 0x2dd   : > { %945 = vrot.lane.b32.xlu1 %v2967_v33, %s2502_s25 }
 0x2e1   : > { %911 = vrot.lane.b32.xlu1 %v909_v32, %s2500_s11 }
 0x347   : > { %v926_v34 = vpop.permute.xlu1 %925  ;;  %v932_v38 = vpop.permute.xlu0 %931 }
 0x348   : > { %v2970_v35 = vpack.c.bf16 %v926_v34, %v926_v34  ;;  %v2976_v40 = vpack.c.bf16 %v932_v38, %v932_v38 }
 0x34a   : > { %995 = vrot.lane.b32.xlu1 %v2970_v35, %s2502_s25 }
 0x34b   : > { %v929_v36 = vpop.permute.xlu1 %928  ;;  %v918_v51 = vpop.permute.xlu0 %917 }
 0x34c   : > { %v2973_v37 = vpack.c.bf16 %v929_v36, %v929_v36  ;;  %v923_v54 = vpack.c.bf16 %v918_v51, %v918_v51 }
 0x34e   : > { %1044 = vrot.lane.b32.xlu1 %v2973_v37, %s2502_s25 }
 0x34f   : > { %v946_v39 = vpop.permute.xlu1 %945 }
 0x350   : > { %v952_v41 = vsel %vm947_vm5, %v946_v39, 0 }
 0x351   : > { %2041 = vmatpush3.bf16.xpose.msra.mxu1 %v952_v41 }
 0x352   : > { %1093 = vrot.lane.b32.xlu1 %v2976_v40, %s2502_s25  ;;  %2052 = vmatprep.subr.bf16.mxu1 %v2497_v9 }
 0x353   : > { %v912_v43 = vpop.permute.xlu1 %911 }
 0x354   : > { %v921_v48 = vpack.c.bf16 %v912_v43, %v912_v43 }
 0x356   : > { %914 = vrot.lane.b32.xlu1 %v909_v32, %s2501_s23 }
 0x358   : > { %2043 = vmatmul.mubr.msk.bf16.vlgmr.msra.gmra.mrb[0].mxu1 %vm947_vm5, %v920_v42 }
 0x359   : > { %2054 = vmatprep.mubr.msk.bf16.mxu1 %vm2498_vm2, %v2497_v9 }
 0x3bc   : > { %v996_v44 = vpop.permute.xlu1 %995 }
 0x3bd   : > { %v1001_v45 = vsel %vm947_vm5, %v996_v44, 0 }
 0x3be   : > { %2047 = vmatpush3.bf16.xpose.msra.mxu0 %v1001_v45 }
 0x3bf   : > { %2058 = vmatprep.subr.bf16.mxu0 %v2497_v9 }
 0x3c0   : > { %v1045_v46 = vpop.permute.xlu1 %1044 }
 0x3c1   : > { %v1050_v47 = vsel %vm947_vm5, %v1045_v46, 0 }
 0x3c2   : > { %2053 = vmatpush3.bf16.xpose.msra.mxu1 %v1050_v47 }
 0x3c3   : > { %2064 = vmatprep.subr.bf16.mxu1 %v2497_v9 }
 0x3c4   : > { %v1094_v49 = vpop.permute.xlu1 %1093 }
 0x3c5   : > { %v1099_v50 = vsel %vm947_vm5, %v1094_v49, 0  ;;  %2049 = vmatmul.mubr.msk.bf16.vlgmr.msra.gmra.mrb[4].mxu0 %vm947_vm5, %v921_v48 }
 0x3c6   : > { %2059 = vmatpush3.bf16.xpose.msra.mxu0 %v1099_v50  ;;  %2060 = vmatprep.mubr.msk.bf16.mxu0 %vm2498_vm2, %v2497_v9 }
 0x3c7   : > { %2070 = vmatprep.subr.bf16.mxu0 %v2497_v9 }
 0x3c8   : > { %v915_v52 = vpop.permute.xlu1 %914 }
 0x3c9   : > { %v922_v53 = vpack.c.bf16 %v915_v52, %v915_v52 }
 0x3cb   : > { %2055 = vmatmul.mubr.msk.bf16.vlgmr.msra.gmra.mrb[4].mxu1 %vm947_vm5, %v922_v53 }
 0x3cc   : > { %2066 = vmatprep.mubr.msk.bf16.mxu1 %vm2498_vm2, %v2497_v9 }
 0x3cd   : > { %2061 = vmatmul.mubr.msk.bf16.vlgmr.msra.gmra.mrb[8].mxu0 %vm947_vm5, %v923_v54 }
 0x3ce   : > { %2072 = vmatprep.mubr.msk.bf16.mxu0 %vm2498_vm2, %v2497_v9 }
 0x42b   : > { %v988_v61 = vpop.f32.mrb[0].mxu1 }
 0x42c   : > { %v989_v62 = vadd.f32 %v988_v61, %v942_v60  ;;  %v2044_v63 = vpop.f32.mrb[1].mxu1 }
 0x42d   : > { %v991_v0 = vpop.f32.mrb[2].mxu1 }
 0x42e   : > { %v2045_v2 = vpop.f32.mrb[3].mxu1  ;;  %v1141_v3 = vsel %vm947_vm5, %v989_v62, -inf }
 0x42f   : > { %1142 = vmax.xlane.f32.xlu1 %v1141_v3 }
 0x498   : > { %v1037_v4 = vpop.f32.mrb[4].mxu0 }
 0x499   : > { %v1038_v5 = vadd.f32 %v1037_v4, %v942_v60  ;;  %v2050_v6 = vpop.f32.mrb[5].mxu0 }
 0x49a   : > { %v1040_v7 = vpop.f32.mrb[6].mxu0 }
 0x49b   : > { %v2051_v8 = vpop.f32.mrb[7].mxu0  ;;  %v1144_v10 = vsel %vm947_vm5, %v1038_v5, -inf }
 0x49c   : > { %1145 = vmax.xlane.f32.xlu0 %v1144_v10  ;;  %v2240_v8 = vld [vmem:[%s2903_s0] sm:$0xff]   ;;  %v2241_v10 = vld [vmem:[%s2903_s0 + $0x8] sm:$0xff]  }
 0x49e   : > { %v1086_v11 = vpop.f32.mrb[4].mxu1 }
 0x49f   : > { %v1087_v12 = vadd.f32 %v1086_v11, %v942_v60  ;;  %v2056_v13 = vpop.f32.mrb[5].mxu1 }
 0x4a0   : > { %v1089_v14 = vpop.f32.mrb[6].mxu1  ;;  %v1135_v15 = vpop.f32.mrb[8].mxu0 }
 0x4a1   : > { %v1136_v16 = vadd.f32 %v1135_v15, %v942_v60  ;;  %v2057_v17 = vpop.f32.mrb[7].mxu1  ;;  %v2062_v18 = vpop.f32.mrb[9].mxu0  ;;  %v1147_v19 = vsel %vm947_vm5, %v1087_v12, -inf }
 0x4a2   : > { %1148 = vmax.xlane.f32.xlu0 %v1147_v19  ;;  %v1138_v20 = vpop.f32.mrb[10].mxu0 }
 0x4a3   : > { %v2063_v21 = vpop.f32.mrb[11].mxu0  ;;  %v1150_v22 = vsel %vm947_vm5, %v1136_v16, -inf }
 0x4a4   : > { %1151 = vmax.xlane.f32.xlu1 %v1150_v22 }
 0x4b5   : > { %1238 = vrot.lane.b32.xlu1 %v2970_v35, %s2503_s16 }
 0x4b8   : > { %1189 = vrot.lane.b32.xlu0 %v2967_v33, %s2503_s16 }
 0x4bc   : > { %v1143_v23 = vpop.xlane.xlu1 %1142 }
 0x4bd   : > { %v1153_v24 = vsub.f32 %v989_v62, %v1143_v23 }
 0x4bf   : > { %v1157_v25 = vmul.f32 1.442695, %v1153_v24 }
 0x4c1   : > { %2252 = vpow2.f32 %v1157_v25 }
 0x4cb   : > { %v2253_v26 = vpop.eup %2252 }
 0x4cc   : > { %v1165_v27 = vsel %vm947_vm5, %v2253_v26, 0.0 }
 0x4d7   : > { %1166 = vadd.xlane.f32.xlu0 %v1165_v27 }
 0x529   : > { %v1146_v28 = vpop.xlane.xlu0 %1145 }
 0x52a   : > { %v1154_v29 = vsub.f32 %v1038_v5, %v1146_v28 }
 0x52c   : > { %v1159_v30 = vmul.f32 1.442695, %v1154_v29 }
 0x52e   : > { %2254 = vpow2.f32 %v1159_v30  ;;  %v1975_v30 = vld [vmem:[%s775_s18] ss:$0 sm:$0xff] }
 0x52f   : > { %v1149_v31 = vpop.xlane.xlu0 %1148 }
 0x530   : > { %v1155_v32 = vsub.f32 %v1087_v12, %v1149_v31 }
 0x531   : > { %v1152_v34 = vpop.xlane.xlu1 %1151 }
 0x532   : > { %v1161_v35 = vmul.f32 1.442695, %v1155_v32  ;;  %v1156_v36 = vsub.f32 %v1136_v16, %v1152_v34 }
 0x533   : > { %v1190_v38 = vpop.permute.xlu0 %1189 }
 0x534   : > { %2256 = vpow2.f32 %v1161_v35  ;;  %v1163_v33 = vmul.f32 1.442695, %v1156_v36  ;;  %v1196_v39 = vsel %vm1194_vm7, %v1190_v38, 0 }
 0x535   : > { %2065 = vmatpush3.bf16.msra.mxu1 %v1196_v39  ;;  %v1239_v41 = vpop.permute.xlu1 %1238 }
 0x536   : > { %2258 = vpow2.f32 %v1163_v33  ;;  %v1244_v42 = vsel %vm1194_vm7, %v1239_v41, 0  ;;  %2076 = vmatprep.subr.bf16.mxu1 %v2497_v9 }
 0x537   : > { %2071 = vmatpush3.bf16.msra.mxu0 %v1244_v42 }
 0x538   : > { %v2255_v43 = vpop.eup %2254  ;;  %2082 = vmatprep.subr.bf16.mxu0 %v2497_v9 }
 0x539   : > { %v1168_v44 = vsel %vm947_vm5, %v2255_v43, 0.0 }
 0x53a   : > { %1169 = vadd.xlane.f32.xlu1 %v1168_v44 }
 0x53e   : > { %v2257_v45 = vpop.eup %2256 }
 0x53f   : > { %v1171_v46 = vsel %vm947_vm5, %v2257_v45, 0.0 }
 0x540   : > { %v2259_v47 = vpop.eup %2258  ;;  %1172 = vadd.xlane.f32.xlu0 %v1171_v46  ;;  %v2243_v46 = vld [vmem:[%s2916_s2 + $0x8] sm:$0xff]  }
 0x541   : > { %v1174_v48 = vsel %vm947_vm5, %v2259_v47, 0.0 }
 0x542   : > { %1175 = vadd.xlane.f32.xlu1 %v1174_v48 }
 0x553   : > { %1286 = vrot.lane.b32.xlu1 %v2973_v37, %s2503_s16 }
 0x556   : > { %1334 = vrot.lane.b32.xlu0 %v2976_v40, %s2503_s16 }
 0x564   : > { %v1167_v49 = vpop.xlane.xlu0 %1166 }
 0x565   : > { %2260 = vrcp.f32 %v1167_v49 }
 0x56f   : > { %v2261_v50 = vpop.eup %2260 }
 0x570   : > { %v1181_v51 = vmul.f32 %v2261_v50, %v2253_v26 }
 0x572   : > { %v1185_v52 = vpack.c.bf16 %v1181_v51, %v1181_v51 }
 0x574   : > { %2067 = vmatmul.mubr.msk.bf16.vlgmr.msra.gmra.mrb[8].mxu1 %vm947_vm5, %v1185_v52 }
 0x575   : > { %2078 = vmatprep.mubr.msk.bf16.mxu1 %vm2498_vm2, %v2497_v9 }
 0x5c7   : > { %v1170_v53 = vpop.xlane.xlu1 %1169 }
 0x5c8   : > { %2262 = vrcp.f32 %v1170_v53 }
 0x5cd   : > { %v1173_v54 = vpop.xlane.xlu0 %1172 }
 0x5ce   : > { %2264 = vrcp.f32 %v1173_v54 }
 0x5cf   : > { %v1176_v55 = vpop.xlane.xlu1 %1175 }
 0x5d0   : > { %2266 = vrcp.f32 %v1176_v55 }
 0x5d1   : > { %v1335_v40 = vpop.permute.xlu0 %1334 }
 0x5d2   : > { %v2263_v37 = vpop.eup %2262  ;;  %v1340_v60 = vsel %vm1194_vm7, %v1335_v40, 0  ;;  %v1980_v40 = vld [vmem:[%s2864_s3] ss:$0 sm:$0xff] }
 0x5d3   : > { %v1182_v56 = vmul.f32 %v2263_v37, %v2255_v43  ;;  %v1287_v57 = vpop.permute.xlu1 %1286  ;;  %v1979_v37 = vld [vmem:[%s778_s1] ss:$0 sm:$0xff] }
 0x5d4   : > { %v1292_v58 = vsel %vm1194_vm7, %v1287_v57, 0 }
 0x5d5   : > { %2077 = vmatpush3.bf16.msra.mxu1 %v1292_v58  ;;  %v1186_v59 = vpack.c.bf16 %v1182_v56, %v1182_v56 }
 0x5d6   : > { %2088 = vmatprep.subr.bf16.mxu1 %v2497_v9 }
 0x5d7   : > { %2073 = vmatmul.mubr.msk.bf16.vlgmr.msra.gmra.mrb[12].mxu0 %vm947_vm5, %v1186_v59 }
 0x5d8   : > { %v2265_v61 = vpop.eup %2264  ;;  %2083 = vmatpush3.bf16.msra.mxu0 %v1340_v60  ;;  %2084 = vmatprep.mubr.msk.bf16.mxu0 %vm2498_vm2, %v2497_v9 }
 0x5d9   : > { %v1183_v62 = vmul.f32 %v2265_v61, %v2257_v45  ;;  %2096 = vmatprep.subr.bf16.mxu0 %v2497_v9  ;;  %v2242_v45 = vld [vmem:[%s2916_s2] sm:$0xff]   ;;  %v2246_v61 = vld [vmem:[%s2922_s6 + $0x10] sm:$0xff]  }
 0x5da   : > { %v2267_v63 = vpop.eup %2266 }
 0x5db   : > { %v1184_v0 = vmul.f32 %v2267_v63, %v2259_v47  ;;  %v1187_v2 = vpack.c.bf16 %v1183_v62, %v1183_v62  ;;  %v2244_v47 = vld [vmem:[%s2922_s6] sm:$0xff]   ;;  %v2247_v62 = vld [vmem:[%s2922_s6 + $0x18] sm:$0xff]  }
 0x5dc   : > { %v1981_v63 = vld [vmem:[%s2928_s13] ss:$0 sm:$0xff] }
 0x5dd   : > { %2079 = vmatmul.mubr.msk.bf16.vlgmr.msra.gmra.mrb[12].mxu1 %vm947_vm5, %v1187_v2  ;;  %v1188_v3 = vpack.c.bf16 %v1184_v0, %v1184_v0 }
 0x5de   : > { %2092 = vmatprep.mubr.msk.bf16.mxu1 %vm2498_vm2, %v2497_v9  ;;  %2089 = vmatpush3.bf16.msra.mxu1 %v2240_v8  ;;  %v1985_v8 = vld [vmem:[%s791_s30] ss:$0 sm:$0xff] }
 0x5df   : > { %2085 = vmatmul.mubr.msk.bf16.vlgmr.msra.gmra.mrb[16].mxu0 %vm947_vm5, %v1188_v3  ;;  %2090 = vmatprep.subr.bf16.mxu1 %v2497_v9 }
 0x5e0   : > { %2100 = vmatprep.mubr.msk.bf16.mxu0 %vm2498_vm2, %v2497_v9  ;;  %2097 = vmatpush3.bf16.msra.mxu0 %v2242_v45 }
 0x5e1   : > { %2098 = vmatprep.subr.bf16.mxu0 %v2497_v9 }
 0x5e2   : > { %2091 = vmatpush3.bf16.msra.mxu1 %v2241_v10 }
 0x5e3   : > { %2104 = vmatprep.subr.bf16.mxu1 %v2497_v9 }
 0x5e4   : > { %2099 = vmatpush3.bf16.msra.mxu0 %v2243_v46 }
 0x647   : > { %v1232_v4 = vpop.f32.mrb[8].mxu1 }
 0x648   : > { %v2068_v5 = vpop.f32.mrb[9].mxu1 }
 0x649   : > { %v1235_v6 = vpop.f32.mrb[10].mxu1 }
 0x64a   : > { %v2069_v7 = vpop.f32.mrb[11].mxu1 }
 0x6aa   : > { %v1280_v11 = vpop.f32.mrb[12].mxu0 }
 0x6ab   : > { %1383 = vrot.lane.b32.xlu1 %v1280_v11, %s2504_s29  ;;  %v2074_v12 = vpop.f32.mrb[13].mxu0 }
 0x6ac   : > { %v1283_v13 = vpop.f32.mrb[14].mxu0 }
 0x6ad   : > { %v2075_v14 = vpop.f32.mrb[15].mxu0 }
 0x6b0   : > { %v1328_v15 = vpop.f32.mrb[12].mxu1 }
 0x6b1   : > { %1387 = vrot.lane.b32.xlu0 %v1328_v15, %s2505_s4  ;;  %v2080_v16 = vpop.f32.mrb[13].mxu1 }
 0x6b2   : > { %v1331_v17 = vpop.f32.mrb[14].mxu1  ;;  %v1376_v18 = vpop.f32.mrb[16].mxu0 }
 0x6b3   : > { %v2081_v19 = vpop.f32.mrb[15].mxu1  ;;  %1391 = vrot.lane.b32.xlu1 %v1376_v18, %s2506_s5  ;;  %v2086_v20 = vpop.f32.mrb[17].mxu0 }
 0x6b4   : > { %v1379_v21 = vpop.f32.mrb[18].mxu0 }
 0x6b5   : > { %v2087_v22 = vpop.f32.mrb[19].mxu0 }
 0x71d   : > { %v1384_v23 = vpop.permute.xlu1 %1383 }
 0x71e   : > { %v1394_v24 = vsel %vm947_vm5, %v1232_v4, %v1384_v23 }
 0x723   : > { %v1388_v25 = vpop.permute.xlu0 %1387 }
 0x724   : > { %v1396_v26 = vsel %vm1395_vm8, %v1394_v24, %v1388_v25 }
 0x725   : > { %v1392_v27 = vpop.permute.xlu1 %1391 }
 0x726   : > { %v1398_v28 = vsel %vm1397_vm9, %v1396_v26, %v1392_v27 }
 0x727   : > { %v1399_v29 = vpack.c.bf16 %v1398_v28, %v1398_v28 }
 0x729   : > { %2093 = vmatmul.mubr.msk.bf16.vlgmr.msra.gmra.mrb[16].mxu1 %vm806_vm1, %v1399_v29 }
 0x72a   : > { %2112 = vmatprep.mubr.msk.bf16.mxu1 %vm2498_vm2, %v2497_v9  ;;  %2105 = vmatpush3.bf16.msra.mxu1 %v2244_v47 }
 0x72b   : > { %2106 = vmatprep.subr.bf16.mxu1 %v2497_v9 }
 0x7fc   : > { %v1460_v31 = vpop.f32.mrb[16].mxu1 }
 0x7fd   : > { %v1461_v32 = vadd.f32 %v1975_v30, %v1460_v31  ;;  %v2094_v34 = vpop.f32.mrb[17].mxu1 }
 0x7fe   : > { %v1463_v35 = vpop.f32.mrb[18].mxu1 }
 0x7ff   : > { %v1466_v36 = vadd.f32 %v1461_v32, %v2933_v1  ;;  %v2095_v38 = vpop.f32.mrb[19].mxu1  ;;  %v2245_v1 = vld [vmem:[%s2922_s6 + $0x8] sm:$0xff]   ;;  %s3276_s6 = sld [smem:[#allocation42_spill]] (!%p1991_p11)  ;;  %v1993_v32 = vld [vmem:[%s3277_s21] ss:$0 sm:$0xff] (!%p1991_p11) }
 0x800   : > { %2107 = vmatpush3.bf16.msra.mxu1 %v2245_v1 }
 0x801   : > { %v1469_v33 = vsel %vm806_vm1, %v1466_v36, 0.0  ;;  %2108 = vmatprep.subr.bf16.mxu1 %v2497_v9 }
 0x802   : > { %1470 = vadd.xlane.f32.xlu0 %v1469_v33 }
 0x804   : > { %2109 = vmatpush3.bf16.msra.mxu1 %v2246_v61 }
 0x805   : > { %2110 = vmatprep.subr.bf16.mxu1 %v2497_v9  ;;  %v1992_v29 = vld [vmem:[%s3276_s6] ss:$0 sm:$0xff] (!%p1991_p11) }
 0x808   : > { %2111 = vmatpush3.bf16.msra.mxu1 %v2247_v62 }
 0x88f   : > { %v1471_v39 = vpop.xlane.xlu0 %1470 }
 0x890   : > { %v1472_v41 = vmul.f32 0.03125, %v1471_v39 }
 0x892   : > { %v1473_v42 = vsub.f32 %v1466_v36, %v1472_v41 }
 0x894   : > { %v1474_v43 = vmul.f32 %v1473_v42, %v1473_v42  ;;  %v1494_v56 = vmul.f32 %v1979_v37, %v1473_v42 }
 0x896   : > { %v1475_v44 = vsel %vm806_vm1, %v1474_v43, 0.0 }
 0x897   : > { %1476 = vadd.xlane.f32.xlu1 %v1475_v44 }
 0x924   : > { %v1477_v48 = vpop.xlane.xlu1 %1476 }
 0x925   : > { %v1478_v49 = vmul.f32 0.032258064, %v1477_v48 }
 0x927   : > { %2268 = vrsqrt.f32 %v1478_v49  ;;  %vm1481_vm10 = vcmp.eq.f32.partialorder %v1478_v49, inf  ;;  %v1484_v52 = vand.u32 2147483648, %v1478_v49  ;;  %vm1483_vm11 = vcmp.eq.f32.partialorder %v1478_v49, 0.0 }
 0x931   : > { %v2269_v50 = vpop.eup %2268 }
 0x932   : > { %v1480_v51 = vmul.f32 %v2269_v50, %v1478_v49 }
 0x934   : > { %v1482_v53 = vsel %vm1481_vm10, %v1478_v49, %v1480_v51 }
 0x935   : > { %v1485_v54 = vsel %vm1483_vm11, %v1484_v52, %v1482_v53 }
 0x936   : > { %v1486_v55 = vadd.f32 1e-06, %v1485_v54 }
 0x938   : > { %2270 = vrcp.f32 %v1486_v55 }
 0x942   : > { %v2271_v57 = vpop.eup %2270 }
 0x943   : > { %v1495_v58 = vmul.f32 %v2271_v57, %v1494_v56 }
 0x945   : > { %v1502_v59 = vadd.f32 %v1980_v40, %v1495_v58 }
 0x947   : > { %v1503_v60 = vpack.c.bf16 %v1502_v59, %v1502_v59 }
 0x949   : > { %2101 = vmatmul.mubr.msk.bf16.vlgmr.msra.gmra.mrb[20].mxu0 %vm806_vm1, %v1503_v60 }
 0xa1c   : > { %v1564_v0 = vpop.f32.mrb[20].mxu0 }
 0xa1d   : > { %v1565_v2 = vadd.f32 %v1981_v63, %v1564_v0  ;;  %v2102_v3 = vpop.f32.mrb[21].mxu0 }
 0xa1e   : > { %v1567_v4 = vpop.f32.mrb[22].mxu0 }
 0xa1f   : > { %v1570_v5 = vmax.f32 %v1565_v2, 0.0  ;;  %v2103_v6 = vpop.f32.mrb[23].mxu0 }
 0xa21   : > { %v1571_v7 = vpack.c.bf16 %v1570_v5, %v1570_v5 }
 0xa23   : > { %2113 = vmatmul.mubr.msk.bf16.vlgmr.msra.gmra.mrb[20].mxu1 %vm1611_vm12, %v1571_v7 }
 0xaf5   : > { %1660 = sbr.rel (%p1991_p11) target bundleno = 3138 (0xc42), region = 104 }
 0xaf6   : > { %v1649_v10 = vpop.f32.mrb[20].mxu1 }
 0xaf7   : > { %v1650_v11 = vadd.f32 %v1985_v8, %v1649_v10  ;;  %v2114_v9 = vpop.f32.mrb[21].mxu1 }
 0xaf8   : > { %v1652_v12 = vpop.f32.mrb[22].mxu1 }
 0xaf9   : > { %v1655_v13 = vadd.f32 %v1650_v11, %v1466_v36  ;;  %v2115_v14 = vpop.f32.mrb[23].mxu1 }
 0xafb   : > { %1656 = vst.msk [vmem:[#allocation2] sm:$0xff] %vm806_vm1, %v1655_v13  ;;  %v1663_v15 = vsel (!%p1991_p11), %vm806_vm1, %v1655_v13, 0.0 }
 0xafc   : > { %1664 = vadd.xlane.f32.xlu0 %v1663_v15 }
 0xb89   : > { %v1665_v16 = vpop.xlane.xlu0 %1664 }
 0xb8a   : > { %v1666_v17 = vmul.f32 0.03125, %v1665_v16 }
 0xb8c   : > { %v1667_v18 = vsub.f32 %v1655_v13, %v1666_v17 }
 0xb8e   : > { %v1668_v19 = vmul.f32 %v1667_v18, %v1667_v18  ;;  %v1688_v30 = vmul.f32 %v1992_v29, %v1667_v18 }
 0xb90   : > { %v1669_v20 = vsel %vm806_vm1, %v1668_v19, 0.0 }
 0xb91   : > { %1670 = vadd.xlane.f32.xlu0 %v1669_v20 }
 0xc1e   : > { %v1671_v21 = vpop.xlane.xlu0 %1670 }
 0xc1f   : > { %v1672_v22 = vmul.f32 0.032258064, %v1671_v21 }
 0xc21   : > { %2272 = vrsqrt.f32 %v1672_v22  ;;  %vm1675_vm13 = vcmp.eq.f32.partialorder %v1672_v22, inf  ;;  %v1678_v25 = vand.u32 2147483648, %v1672_v22  ;;  %vm1677_vm14 = vcmp.eq.f32.partialorder %v1672_v22, 0.0 }
 0xc2b   : > { %v2273_v23 = vpop.eup %2272 }
 0xc2c   : > { %v1674_v24 = vmul.f32 %v2273_v23, %v1672_v22 }
 0xc2e   : > { %v1676_v26 = vsel %vm1675_vm13, %v1672_v22, %v1674_v24 }
 0xc2f   : > { %v1679_v27 = vsel %vm1677_vm14, %v1678_v25, %v1676_v26 }
 0xc30   : > { %v1680_v28 = vadd.f32 1e-06, %v1679_v27 }
 0xc32   : > { %2274 = vrcp.f32 %v1680_v28 }
 0xc3c   : > { %v2275_v31 = vpop.eup %2274 }
 0xc3d   : > { %v1689_v34 = vmul.f32 %v2275_v31, %v1688_v30 }
 0xc3f   : > { %v1696_v35 = vadd.f32 %v1993_v32, %v1689_v34 }
 0xc41   : > { %1697 = vst.msk [vmem:[%s2930_s12] sm:$0xff] %vm806_vm1, %v1696_v35 }
 0xc42 PF: > { %s3278_s10 = sld [smem:[#allocation27_spill]]  ;;  %s3279_s17 = sld [smem:[#allocation24_spill]] }
 0xc43   : > { %s1995_s14 = sshll.u32 %s2480_s28, 7  ;;  %s3280_s25 = sld [smem:[#allocation44_spill]] }
 0xc44   : > { %s1712_s22 = sshll.u32 %s2930_s12, 4  ;;  %s2507_s29 = smov [#allocation9]   ;;  %s1713_s22 = int_to_ptr.vmem [resolvable:$true] %s1712_s22 }
 0xc45   : > { %s2366_s16 = scalar_lea.vmem %s1713_s22, 128  ;;  %s2370_s4 = sshll.u32 %s2507_s29, 4  ;;  %s2371_s4 = int_to_ptr.vmem [resolvable:$false] %s2370_s4 }
 0xc46   : > { %p2367_p7 = scmp.ne.s32.totalorder %s1713_s22, %s2366_s16  ;;  %s2372_s5 = scalar_lea.vmem %s2371_s4, 256 }
 0xc47   : > { %p2373_p12 = scmp.lt.s32.totalorder %s1713_s22, %s2371_s4  ;;  %p2374_p8 = scmp.lt.s32.totalorder %s2372_s5, %s2366_s16 }
 0xc48   : > { %s1699_s19 = scalar_lea.sflag [#allocation5], %s3278_s10  ;;  %p3282_p13 = scmp.ne.s32.totalorder %s3279_s17, 0 }
 0xc49   : > { %s3281_s15 = smov %s3280_s25  ;;  %s3096_s24 = scalar_lea.hbm %s3280_s25, %s1995_s14 }
 0xc4a   : > { %p2368_p0 = pnand %p2367_p7, %p3282_p13  ;;  %p2375_p2 = por %p2374_p8, %p2373_p12 }
 0xc4c   : > { %p2369_p3 = pneg %p2368_p0 }
 0xc4e   : > { %p2376_p6 = pnand %p2375_p2, %p2369_p3 }
 0xc50   : > { %2379 = shalt.err (!%p2376_p6)
}
 0xc51   : > { %s2380_s28 = scalar_lea.hbm %s3096_s24, 128  ;;  %s2384_s8 = scalar_lea.hbm %s3281_s15, 256 }
 0xc52   : > { %p2381_p10 = scmp.ne.s32.totalorder %s3096_s24, %s2380_s28  ;;  %p2385_p5 = scmp.lt.u32.totalorder %s3096_s24, %s3281_s15 }
 0xc53   : > { %p2386_p1 = scmp.lt.u32.totalorder %s2384_s8, %s2380_s28  ;;  %p2388_p7 = scmp.lt.u32.totalorder %s2380_s28, %s3096_s24 }
 0xc54   : > { %p2382_p9 = pnand %p2381_p10, %p3282_p13 }
 0xc55   : > { %p2387_p11 = por %p2386_p1, %p2385_p5 }
 0xc56   : > { %p2383_p4 = pneg %p2382_p9 }
 0xc57   : > { %p2389_p0 = por %p2388_p7, %p2387_p11 }
 0xc59   : > { %p2390_p3 = pnand %p2389_p0, %p2383_p4 }
 0xc5b   : > { %2393 = shalt.err (!%p2390_p3)
}
 0xc5c   : > { %2122 = dma.vmem_to_hbm [thread:$0]  (%p3282_p13), %s1713_s22, 128, %s3096_s24, %s1699_s19  }
 0xc5d PF: > { %s3283_s18 = sld [smem:[#allocation20_spill]]  ;;  %s3284_s20 = sld [smem:[#allocation15_spill]] }
 0xc5e   : > { %s3285_s3 = sld [smem:[#allocation25_spill]] }
 0xc63   : > { %p2139_p12 = scmp.ge.s32.totalorder %s3283_s18, 2  ;;  %s1724_s1 = sand.u32 1, %s3284_s20  }
 0xc64   : > { %p3286_p8 = scmp.ne.s32.totalorder %s3285_s3, 0  ;;  %s1725_s7 = scalar_lea.sflag [#allocation5], %s1724_s1 }
 0xc66   : > { %p2135_p2 = pnand %p2139_p12, %p3286_p8 }
 0xc68   : > { %2447 = dma.done.wait (!%p2135_p2), %s1725_s7, 128  }
 0xc69   : > { %2449 = vsyncadd (!%p2135_p2), %s1725_s7, 4294967168  ;;  %s35_s0 = sadd.s32 1, %s3283_s18   ;;  %s3287_s21 = sld [smem:[#allocation13_spill]] }
 0xc6a   : > { %p32_p6 = scmp.ge.s32.totalorder %s35_s0, 6   ;;  %s3288_s22 = sld [smem:[#allocation14_spill]] }
 0xc6b   : > { %s3289_s23 = sld [smem:[#allocation22_spill]]  ;;  %s3290_s24 = sld [smem:[#allocation16_spill]] }
 0xc6c   : > { %s3291_s25 = sld [smem:[#allocation17_spill]]  ;;  %s3292_s26 = sld [smem:[#allocation26_spill]] }
 0xc6d   : > { %s3293_s27 = sld [smem:[#allocation18_spill]]  ;;  %s3294_s28 = sld [smem:[#allocation19_spill]] }
 0xc6e   : > { %s3295_s29 = sld [smem:[#allocation21_spill]]  ;;  %s3296_s30 = sld [smem:[#allocation23_spill]] }
 0xc6f   :  { %34 = sbr.rel (!%p32_p6) target bundleno = 29 (0x1d), region = 194 }
 0xc76   :  { %1730 = vsyncpa [#allocation4], 1 }
 0xc77   :  { %1732 = vsyncpa [#allocation4 + $0x1], 1 }
 0xc78   :  { %1733 = vsyncpa [#allocation7], 1 }
 0xc79   :  { %1735 = vsyncpa [#allocation7 + $0x1], 1 }
 0xc7a   :  { %1736 = vsyncpa [#allocation5], 1 }
 0xc7b   :  { %1738 = vsyncpa [#allocation5 + $0x1], 1 }

</bundles_post_ra>
